<compile_context>
chip_gen: v7x
topology: tpu7x:2x2x1
jax: 0.10.0
libtpu: 0.0.40
codegen_flags: <defaults>
</compile_context>

<pallas_src>
import numpy as np
import jax
import jax.numpy as jnp
from jax.experimental import pallas as pl
from jax.experimental.pallas import tpu as pltpu


def _inv_freq(head_dim, rope_theta):
    return 1.0 / (rope_theta ** (jnp.arange(0, head_dim, 2, dtype=jnp.float32) / head_dim))


def _pick_seq_block(seq_len, target):
    """Largest divisor of seq_len that is <= target (prefer multiples of 8)."""
    if seq_len <= target:
        return seq_len
    for cand in range(min(target, seq_len), 0, -1):
        if seq_len % cand == 0 and cand % 8 == 0:
            return cand
    for cand in range(min(target, seq_len), 0, -1):
        if seq_len % cand == 0:
            return cand
    return seq_len


def _make_rope_kernel(head_dim, swap_block, interleaved):
    nb = head_dim // swap_block

    def kernel(pos_q_ref, pos_k_ref, f_ref, perm_ref, q_ref, k_ref, qo_ref, ko_ref):
        f_row = f_ref[...]                       # (1, D) f32, sign-folded per-lane frequencies
        perm_m = perm_ref[...]                   # (D, D) f32, constant 0/1 permutation

        def apply(pos_ref, x_ref, o_ref):
            # positions per row (rows = tS * heads), angles and cos/sin per lane.
            ang = pos_ref[0].astype(jnp.float32) * f_row            # (rows,1)*(1,D) -> (rows,D)
            cosv = jnp.cos(ang)
            sinv = jnp.sin(ang)                                     # sign already folded into f_row

            x = x_ref[0].astype(jnp.float32)                        # (rows, D)
            if interleaved:
                # v = deinterleave-by-4 of x along D (fixed permutation, via idle MXU; exact).
                v = jnp.dot(x, perm_m,
                            preferred_element_type=jnp.float32,
                            precision=jax.lax.Precision.HIGHEST)
            else:
                v = x

            # partner: swap contiguous blocks pairwise (quarters for interleaved, halves otherwise)
            blocks = [v[:, i * swap_block:(i + 1) * swap_block] for i in range(nb)]
            partner = jnp.concatenate([blocks[i ^ 1] for i in range(nb)], axis=-1)

            # single lane-dense full-block store
            o_ref[0] = (v * cosv + partner * sinv).astype(o_ref.dtype)

        apply(pos_q_ref, q_ref, qo_ref)
        apply(pos_k_ref, k_ref, ko_ref)

    return kernel


def hf_rotary_embedding(q, k, positions, *, rope_theta=10000.0, interleaved=True,
                        block_seq=256, vmem_limit_bytes=None):
    """Matches HFRotaryEmbedding.forward(q, k, positions).

    q: (B, S, Hq, D), k: (B, S, Hk, D), positions: (B, S) int.
    """
    B, S, Hq, D = q.shape
    Bk, Sk, Hk, Dk = k.shape
    assert (B, S, D) == (Bk, Sk, Dk), "q/k batch, seq and head_dim must match"
    assert D % 4 == 0, "head_dim must be divisible by 4"
    half = D // 2

    inv_freq = _inv_freq(D, rope_theta)                              # (half,)

    if interleaved:
        quarter = D // 4
        fe, fo = inv_freq[0::2], inv_freq[1::2]                      # (quarter,) each
        f_lane = jnp.concatenate([fe, fe, fo, fo])                   # (D,)
        sign = jnp.concatenate([-jnp.ones_like(fe), jnp.ones_like(fe),
                                -jnp.ones_like(fo), jnp.ones_like(fo)])
        swap_block = quarter
        # deinterleave-by-4 permutation matrix: v[i] = x[4*(i % quarter) + i // quarter]
        idx = np.arange(D)
        src = 4 * (idx % quarter) + idx // quarter
        perm_np = np.zeros((D, D), np.float32)
        perm_np[src, idx] = 1.0
        perm = jnp.asarray(perm_np)
    else:
        f_lane = jnp.concatenate([inv_freq, inv_freq])
        sign = jnp.concatenate([-jnp.ones((half,), jnp.float32),
                                jnp.ones((half,), jnp.float32)])
        swap_block = half
        perm = jnp.eye(D, dtype=jnp.float32)                         # unused (matmul skipped)

    f_signed = (f_lane * sign).astype(jnp.float32).reshape(1, D)

    # Free, contiguous reshapes: fold heads into the row axis.
    qf = q.reshape(B, S * Hq, D)
    kf = k.reshape(B, S * Hk, D)
    pos = positions.astype(jnp.int32)
    pos_q = jnp.broadcast_to(pos[:, :, None], (B, S, Hq)).reshape(B, S * Hq, 1)
    pos_k = jnp.broadcast_to(pos[:, :, None], (B, S, Hk)).reshape(B, S * Hk, 1)

    tS = _pick_seq_block(S, block_seq)
    grid = (B, S // tS)
    rows_q = tS * Hq
    rows_k = tS * Hk

    in_specs = [
        pl.BlockSpec((1, rows_q, 1), lambda b, s: (b, s, 0)),        # positions (q rows)
        pl.BlockSpec((1, rows_k, 1), lambda b, s: (b, s, 0)),        # positions (k rows)
        pl.BlockSpec((1, D), lambda b, s: (0, 0)),                   # sign-folded per-lane freqs
        pl.BlockSpec((D, D), lambda b, s: (0, 0)),                   # permutation matrix
        pl.BlockSpec((1, rows_q, D), lambda b, s: (b, s, 0)),        # q
        pl.BlockSpec((1, rows_k, D), lambda b, s: (b, s, 0)),        # k
    ]
    out_specs = [
        pl.BlockSpec((1, rows_q, D), lambda b, s: (b, s, 0)),
        pl.BlockSpec((1, rows_k, D), lambda b, s: (b, s, 0)),
    ]

    cp = dict(dimension_semantics=("parallel", "parallel"))
    if vmem_limit_bytes is not None:
        cp["vmem_limit_bytes"] = vmem_limit_bytes

    q_out, k_out = pl.pallas_call(
        _make_rope_kernel(D, swap_block, interleaved),
        out_shape=(
            jax.ShapeDtypeStruct((B, S * Hq, D), q.dtype),
            jax.ShapeDtypeStruct((B, S * Hk, D), k.dtype),
        ),
        grid=grid,
        in_specs=in_specs,
        out_specs=out_specs,
        compiler_params=pltpu.CompilerParams(**cp),
    )(pos_q, pos_k, f_signed, perm, qf, kf)

    return q_out.reshape(B, S, Hq, D), k_out.reshape(B, S, Hk, D)


# ---------------------------------------------------------------------------
# Pure-JAX reproduction of the PyTorch forward (for verification only).
# ---------------------------------------------------------------------------
def _pairwise_shuffle(x):
    """torch's x.unflatten(-1,(d//2,2)).transpose(-1,-2).flatten(-2,-1)."""
    d = x.shape[-1]
    xr = x.reshape(x.shape[:-1] + (d // 2, 2))
    return jnp.swapaxes(xr, -1, -2).reshape(x.shape[:-1] + (d,))


def _reference(q, k, positions, *, rope_theta=10000.0, interleaved=True):
    B, S, _, D = q.shape
    half = D // 2
    inv_freq = _inv_freq(D, rope_theta)
    freqs = positions.astype(jnp.float32)[..., None] * inv_freq[None, None, :]   # (B,S,half)
    emb = jnp.concatenate([freqs, freqs], axis=-1)                               # (B,S,D)
    cos = jnp.cos(emb)[:, :, None, :].astype(q.dtype)                            # unsqueeze_dim=2
    sin = jnp.sin(emb)[:, :, None, :].astype(q.dtype)

    def rotate_half(x):
        return jnp.concatenate([-x[..., half:], x[..., :half]], axis=-1)

    if interleaved:
        q = _pairwise_shuffle(q)
        k = _pairwise_shuffle(k)
    q_emb = q * cos + rotate_half(q) * sin
    k_emb = k * cos + rotate_half(k) * sin
    if interleaved:
        q_emb = _pairwise_shuffle(q_emb)
        k_emb = _pairwise_shuffle(k_emb)
    return q_emb, k_emb


if __name__ == "__main__":
    B, S, Hq, Hk, D = 2, 8, 4, 2, 32
    key = jax.random.PRNGKey(0)
    kq, kk, kp = jax.random.split(key, 3)
    q = jax.random.normal(kq, (B, S, Hq, D), dtype=jnp.float32)
    k = jax.random.normal(kk, (B, S, Hk, D), dtype=jnp.float32)
    positions = jax.random.randint(kp, (B, S), 0, 64, dtype=jnp.int32)

    q_out, k_out = hf_rotary_embedding(q, k, positions, interleaved=True)
    jax.block_until_ready((q_out, k_out))

    q_ref, k_ref = _reference(q, k, positions, interleaved=True)
    assert q_out.shape == q.shape and k_out.shape == k.shape
    assert jnp.allclose(q_out, q_ref, atol=1e-4, rtol=1e-4)
    assert jnp.allclose(k_out, k_ref, atol=1e-4, rtol=1e-4)

    print("KERNEL_OK")
</pallas_src>

<mosaic_0001>
module attributes {stable_mosaic.version = 11 : i64} {
  func.func @kernel(%arg0: i32, %arg1: i32, %arg2: memref<1x32x1xi32, #tpu.memory_space<vmem>>, %arg3: memref<1x16x1xi32, #tpu.memory_space<vmem>>, %arg4: memref<1x32xf32, #tpu.memory_space<vmem>>, %arg5: memref<32x32xf32, #tpu.memory_space<vmem>>, %arg6: memref<1x32x32xf32, #tpu.memory_space<vmem>>, %arg7: memref<1x16x32xf32, #tpu.memory_space<vmem>>, %arg8: memref<1x32x32xf32, #tpu.memory_space<vmem>>, %arg9: memref<1x16x32xf32, #tpu.memory_space<vmem>>) attributes {dimension_semantics = [#tpu.dimension_semantics<parallel>, #tpu.dimension_semantics<parallel>], iteration_bounds = array<i64: 2, 1>, scalar_prefetch = 0 : i64, scratch_operands = 0 : i64, tpu.core_type = #tpu.core_type<tc>, window_params = [{transform_indices = @transform_0, window_bounds = array<i64: 1, 32, 1>}, {transform_indices = @transform_1, window_bounds = array<i64: 1, 16, 1>}, {pipeline_mode = #tpu.pipeline_mode<synchronous>, transform_indices = @transform_2, window_bounds = array<i64: 1, 32>}, {pipeline_mode = #tpu.pipeline_mode<synchronous>, transform_indices = @transform_3, window_bounds = array<i64: 32, 32>}, {transform_indices = @transform_4, window_bounds = array<i64: 1, 32, 32>}, {transform_indices = @transform_5, window_bounds = array<i64: 1, 16, 32>}, {transform_indices = @transform_6, window_bounds = array<i64: 1, 32, 32>}, {transform_indices = @transform_7, window_bounds = array<i64: 1, 16, 32>}]} {
    %c0 = arith.constant 0 : index
    %c0_0 = arith.constant 0 : index
    %0 = vector.load %arg4[%c0, %c0_0] : memref<1x32xf32, #tpu.memory_space<vmem>>, vector<1x32xf32>
    %c0_1 = arith.constant 0 : index
    %c0_2 = arith.constant 0 : index
    %1 = vector.load %arg5[%c0_1, %c0_2] : memref<32x32xf32, #tpu.memory_space<vmem>>, vector<32x32xf32>
    %c0_3 = arith.constant 0 : index
    %c0_4 = arith.constant 0 : index
    %c0_5 = arith.constant 0 : index
    %2 = vector.load %arg2[%c0_3, %c0_4, %c0_5] : memref<1x32x1xi32, #tpu.memory_space<vmem>>, vector<1x32x1xi32>
    %3 = vector.shape_cast %2 : vector<1x32x1xi32> to vector<32x1xi32>
    %4 = arith.sitofp %3 : vector<32x1xi32> to vector<32x1xf32>
    %5 = vector.broadcast %4 : vector<32x1xf32> to vector<32x32xf32>
    %6 = vector.broadcast %0 : vector<1x32xf32> to vector<32x32xf32>
    %7 = arith.mulf %5, %6 : vector<32x32xf32>
    %8 = math.cos %7 : vector<32x32xf32>
    %9 = math.sin %7 : vector<32x32xf32>
    %c0_6 = arith.constant 0 : index
    %c0_7 = arith.constant 0 : index
    %c0_8 = arith.constant 0 : index
    %10 = vector.load %arg6[%c0_6, %c0_7, %c0_8] : memref<1x32x32xf32, #tpu.memory_space<vmem>>, vector<1x32x32xf32>
    %11 = vector.shape_cast %10 : vector<1x32x32xf32> to vector<32x32xf32>
    %cst = arith.constant dense<0.000000e+00> : vector<32x32xf32>
    %12 = tpu.matmul %11, %1, %cst {dimension_numbers = #tpu.dot_dimension_numbers<[1], [0], [0], [1], [0, 0, 1, 1], [], []>, precision = #tpu.contract_precision<fp32>} : vector<32x32xf32>, vector<32x32xf32>, vector<32x32xf32> -> vector<32x32xf32>
    %13 = vector.extract_strided_slice %12 {offsets = [0, 0], sizes = [32, 8], strides = [1, 1]} : vector<32x32xf32> to vector<32x8xf32>
    %14 = vector.extract_strided_slice %12 {offsets = [0, 8], sizes = [32, 8], strides = [1, 1]} : vector<32x32xf32> to vector<32x8xf32>
    %15 = vector.extract_strided_slice %12 {offsets = [0, 16], sizes = [32, 8], strides = [1, 1]} : vector<32x32xf32> to vector<32x8xf32>
    %16 = vector.extract_strided_slice %12 {offsets = [0, 24], sizes = [32, 8], strides = [1, 1]} : vector<32x32xf32> to vector<32x8xf32>
    %17 = tpu.concatenate %14, %13, %16, %15 in 1 : vector<32x8xf32>, vector<32x8xf32>, vector<32x8xf32>, vector<32x8xf32> -> vector<32x32xf32>
    %18 = arith.mulf %12, %8 : vector<32x32xf32>
    %19 = arith.mulf %17, %9 : vector<32x32xf32>
    %20 = arith.addf %18, %19 : vector<32x32xf32>
    %c0_9 = arith.constant 0 : index
    %c0_10 = arith.constant 0 : index
    %c0_11 = arith.constant 0 : index
    %21 = vector.load %arg8[%c0_9, %c0_10, %c0_11] : memref<1x32x32xf32, #tpu.memory_space<vmem>>, vector<1x32x32xf32>
    %22 = vector.shape_cast %21 : vector<1x32x32xf32> to vector<32x32xf32>
    %23 = vector.shape_cast %20 : vector<32x32xf32> to vector<1x32x32xf32>
    tpu.vector_store %arg8[%c0_9, %c0_10, %c0_11], %23 {strides = array<i32>} : memref<1x32x32xf32, #tpu.memory_space<vmem>>, vector<1x32x32xf32>,
    %c0_12 = arith.constant 0 : index
    %c0_13 = arith.constant 0 : index
    %c0_14 = arith.constant 0 : index
    %24 = vector.load %arg3[%c0_12, %c0_13, %c0_14] : memref<1x16x1xi32, #tpu.memory_space<vmem>>, vector<1x16x1xi32>
    %25 = vector.shape_cast %24 : vector<1x16x1xi32> to vector<16x1xi32>
    %26 = arith.sitofp %25 : vector<16x1xi32> to vector<16x1xf32>
    %27 = vector.broadcast %26 : vector<16x1xf32> to vector<16x32xf32>
    %28 = vector.broadcast %0 : vector<1x32xf32> to vector<16x32xf32>
    %29 = arith.mulf %27, %28 : vector<16x32xf32>
    %30 = math.cos %29 : vector<16x32xf32>
    %31 = math.sin %29 : vector<16x32xf32>
    %c0_15 = arith.constant 0 : index
    %c0_16 = arith.constant 0 : index
    %c0_17 = arith.constant 0 : index
    %32 = vector.load %arg7[%c0_15, %c0_16, %c0_17] : memref<1x16x32xf32, #tpu.memory_space<vmem>>, vector<1x16x32xf32>
    %33 = vector.shape_cast %32 : vector<1x16x32xf32> to vector<16x32xf32>
    %cst_18 = arith.constant dense<0.000000e+00> : vector<16x32xf32>
    %34 = tpu.matmul %33, %1, %cst_18 {dimension_numbers = #tpu.dot_dimension_numbers<[1], [0], [0], [1], [0, 0, 1, 1], [], []>, precision = #tpu.contract_precision<fp32>} : vector<16x32xf32>, vector<32x32xf32>, vector<16x32xf32> -> vector<16x32xf32>
    %35 = vector.extract_strided_slice %34 {offsets = [0, 0], sizes = [16, 8], strides = [1, 1]} : vector<16x32xf32> to vector<16x8xf32>
    %36 = vector.extract_strided_slice %34 {offsets = [0, 8], sizes = [16, 8], strides = [1, 1]} : vector<16x32xf32> to vector<16x8xf32>
    %37 = vector.extract_strided_slice %34 {offsets = [0, 16], sizes = [16, 8], strides = [1, 1]} : vector<16x32xf32> to vector<16x8xf32>
    %38 = vector.extract_strided_slice %34 {offsets = [0, 24], sizes = [16, 8], strides = [1, 1]} : vector<16x32xf32> to vector<16x8xf32>
    %39 = tpu.concatenate %36, %35, %38, %37 in 1 : vector<16x8xf32>, vector<16x8xf32>, vector<16x8xf32>, vector<16x8xf32> -> vector<16x32xf32>
    %40 = arith.mulf %34, %30 : vector<16x32xf32>
    %41 = arith.mulf %39, %31 : vector<16x32xf32>
    %42 = arith.addf %40, %41 : vector<16x32xf32>
    %c0_19 = arith.constant 0 : index
    %c0_20 = arith.constant 0 : index
    %c0_21 = arith.constant 0 : index
    %43 = vector.load %arg9[%c0_19, %c0_20, %c0_21] : memref<1x16x32xf32, #tpu.memory_space<vmem>>, vector<1x16x32xf32>
    %44 = vector.shape_cast %43 : vector<1x16x32xf32> to vector<16x32xf32>
    %45 = vector.shape_cast %42 : vector<16x32xf32> to vector<1x16x32xf32>
    tpu.vector_store %arg9[%c0_19, %c0_20, %c0_21], %45 {strides = array<i32>} : memref<1x16x32xf32, #tpu.memory_space<vmem>>, vector<1x16x32xf32>,
    return
  }
  func.func @transform_0(%arg0: i32, %arg1: i32) -> (i32, i32, i32) {
    %c0_i32 = arith.constant 0 : i32
    %c0_i32_0 = arith.constant 0 : i32
    return %arg0, %arg1, %c0_i32 : i32, i32, i32
  }
  func.func @transform_1(%arg0: i32, %arg1: i32) -> (i32, i32, i32) {
    %c0_i32 = arith.constant 0 : i32
    %c0_i32_0 = arith.constant 0 : i32
    return %arg0, %arg1, %c0_i32 : i32, i32, i32
  }
  func.func @transform_2(%arg0: i32, %arg1: i32) -> (i32, i32) {
    %c0_i32 = arith.constant 0 : i32
    %c0_i32_0 = arith.constant 0 : i32
    %c0_i32_1 = arith.constant 0 : i32
    return %c0_i32, %c0_i32_0 : i32, i32
  }
  func.func @transform_3(%arg0: i32, %arg1: i32) -> (i32, i32) {
    %c0_i32 = arith.constant 0 : i32
    %c0_i32_0 = arith.constant 0 : i32
    %c0_i32_1 = arith.constant 0 : i32
    return %c0_i32, %c0_i32_0 : i32, i32
  }
  func.func @transform_4(%arg0: i32, %arg1: i32) -> (i32, i32, i32) {
    %c0_i32 = arith.constant 0 : i32
    %c0_i32_0 = arith.constant 0 : i32
    return %arg0, %arg1, %c0_i32 : i32, i32, i32
  }
  func.func @transform_5(%arg0: i32, %arg1: i32) -> (i32, i32, i32) {
    %c0_i32 = arith.constant 0 : i32
    %c0_i32_0 = arith.constant 0 : i32
    return %arg0, %arg1, %c0_i32 : i32, i32, i32
  }
  func.func @transform_6(%arg0: i32, %arg1: i32) -> (i32, i32, i32) {
    %c0_i32 = arith.constant 0 : i32
    %c0_i32_0 = arith.constant 0 : i32
    return %arg0, %arg1, %c0_i32 : i32, i32, i32
  }
  func.func @transform_7(%arg0: i32, %arg1: i32) -> (i32, i32, i32) {
    %c0_i32 = arith.constant 0 : i32
    %c0_i32_0 = arith.constant 0 : i32
    return %arg0, %arg1, %c0_i32 : i32, i32, i32
  }
}

</mosaic_0001>

<bundles_post_ra>
// kernel: tpu_custom_call.1
= control target key start
LH: loop header
LB: loop body
LE: loop exit
PB: predicated region body
PF: predicated region fallthrough
CT: control target
= control target key end

     0   :  { %s5369_s0 = inlined_call_operand.vmem [shape: s32[2,32,1], index: 0, kind: input, shape index: {}]   ;;  %s5370_s1 = inlined_call_operand.vmem [shape: s32[2,16,1], index: 1, kind: input, shape index: {}]   ;;  %s5371_s2 = inlined_call_operand.vmem [shape: f32[1,32], index: 2, kind: input, shape index: {}]   ;;  %s5372_s3 = inlined_call_operand.vmem [shape: f32[32,32], index: 3, kind: input, shape index: {}]   ;;  %s5373_s4 = inlined_call_operand.vmem [shape: f32[2,32,32], index: 4, kind: input, shape index: {}]   ;;  %s5374_s5 = inlined_call_operand.hbm [shape: f32[2,16,32], index: 5, kind: input, shape index: {}]   ;;  %s5375_s6 = inlined_call_operand.hbm [shape: f32[2,32,32], index: 6, kind: output, shape index: {0}]   ;;  %s5376_s7 = inlined_call_operand.hbm [shape: f32[2,16,32], index: 7, kind: output, shape index: {1}]  }
   0x1   :  { %5386 = sst [smem:[#allocation12_spill]] %s5374_s5 }
   0x2   :  { %13 = vsyncpa [#allocation3], 0 }
   0x3   :  { %15 = vsyncpa [#allocation3 + $0x1], 0 }
   0x4   :  { %16 = vsyncpa [#allocation4], 0 }
   0x5   :  { %18 = vsyncpa [#allocation4 + $0x1], 0 }
   0x6   :  { %19 = vsyncpa [#allocation7], 0 }
   0x7   :  { %21 = vsyncpa [#allocation7 + $0x1], 0  ;;  %s3979_s24 = smov 0   ;;  %s3981_s25 = smov 0  }
   0x8   :  { %s3983_s26 = smov 0   ;;  %s3985_s27 = smov 0  }
   0x9   :  { %s3987_s28 = smov 0   ;;  %s3989_s29 = smov 0  }
   0xa LB: > { %s3209_s30 = sadd.s32 4294967295, %s3922_s29   ;;  %s3210_s8 = sadd.s32 4294967294, %s3922_s29   ;;  %s3922_s29 = sphi %s3989_s29, %s27_s29   ;;  %s3918_s28 = sphi %s3987_s28, %s5431_s28   ;;  %s3914_s27 = sphi %s3985_s27, %s5430_s27   ;;  %s3910_s26 = sphi %s3983_s26, %s5429_s26   ;;  %s3906_s25 = sphi %s3981_s25, %s5428_s25   ;;  %s3902_s24 = sphi %s3979_s24, %s5427_s24  }
   0xb   : > { %s39_s9 = sadd.s32 1, %s3918_s28  ;;  %s174_s10 = sadd.s32 1, %s3910_s26 }
   0xc   : > { %p41_p0 = scmp.ge.s32.totalorder %s39_s9, 2  ;;  %p181_p1 = scmp.ne.s32.totalorder %s3910_s26, %s3906_s25 }
   0xd   : > { %p182_p2 = scmp.eq.s32.totalorder %s3922_s29, 0  ;;  %p187_p3 = scmp.ne.s32.totalorder %s3906_s25, %s3902_s24 }
   0xe   : > { %s5433_s9 = smov (%p41_p0, %s39_s9), 0  ;;  %p188_p5 = scmp.eq.s32.totalorder %s3209_s30, 0 }
   0xf   : > { %5387 = sst [smem:[#allocation11_spill]] %s5433_s9  ;;  %p4020_p4 = por %p182_p2, %p181_p1 }
  0x10   : > { %s169_s12 = ssub.s32 %s3918_s28, %s5433_s9  ;;  %p213_p6 = scmp.eq.s32.totalorder %s3209_s30, 1 }
  0x11   : > { %p172_p7 = scmp.eq.s32.totalorder %s169_s12, 0  ;;  %p4026_p8 = por %p188_p5, %p187_p3 }
  0x12   : > { %p4030_p9 = por %p213_p6, %p181_p1  ;;  %p219_p10 = scmp.eq.s32.totalorder %s3210_s8, 1 }
  0x13   : > { %s4035_s15 = scalar_select %p172_p7, %s3910_s26, %s174_s10  }
  0x14   : > { %s5390_s14 = scalar_select %p4030_p9, 1, 0 }
  0x15   : > { %p4037_p11 = por %p219_p10, %p187_p3  ;;  %p3690_p13 = scmp.lt.s32.totalorder %s3922_s29, 2 }
  0x16   : > { %s312_s17 = sand.u32 1, %s3910_s26   ;;  %s3283_s19 = sshll.u32 %s3918_s28, 8 }
  0x17   : > { %s5391_s16 = scalar_select %p4037_p11, 1, 0 }
  0x18   : > { %s3213_s18 = sshll.u32 %s312_s17, 4  ;;  %s5392_s5 = sld [smem:[#allocation12_spill]] }
  0x19   : > { %s316_s23 = scalar_lea.vmem [#allocation2], %s3213_s18  ;;  %p4054_p0 = pnand %p3690_p13, %p4020_p4 }
  0x1a   : > { %s325_s30 = sshll.u32 %s316_s23, 4  ;;  %s4059_s10 = scalar_lea.sflag [#allocation3], %s312_s17  ;;  %s4050_s30 = int_to_ptr.vmem [resolvable:$true] %s325_s30 }
  0x1b   : > { %p3780_p3 = pneg %p4054_p0 }
  0x1e   : > { %s4048_s22 = scalar_lea.hbm %s5392_s5, %s3283_s19  ;;  %s3783_s11 = scalar_lea.hbm %s5392_s5, 512 }
  0x1f   : > { %s3778_s12 = scalar_lea.hbm %s4048_s22, 256  ;;  %p3784_p4 = scmp.lt.u32.totalorder %s4048_s22, %s5392_s5 }
  0x20   : > { %p3779_p2 = scmp.ne.s32.totalorder %s4048_s22, %s3778_s12  ;;  %p3785_p7 = scmp.lt.u32.totalorder %s3783_s11, %s3778_s12 }
  0x21   : > { %p3787_p13 = scmp.lt.u32.totalorder %s3778_s12, %s4048_s22 }
  0x22   : > { %p3781_p5 = pnand %p3780_p3, %p3779_p2  ;;  %p3786_p10 = por %p3785_p7, %p3784_p4 }
  0x24   : > { %p3782_p6 = pneg %p3781_p5  ;;  %p3788_p12 = por %p3787_p13, %p3786_p10 }
  0x26   : > { %p3789_p1 = pnand %p3788_p12, %p3782_p6 }
  0x28   : > { %3792 = shalt.err (!%p3789_p1)
}
  0x29   : > { %s3793_s17 = scalar_lea.vmem %s4050_s30, 256  ;;  %s3924_s23 = smov [#allocation2]  }
  0x2a   : > { %p3794_p2 = scmp.ne.s32.totalorder %s4050_s30, %s3793_s17  ;;  %s3798_s18 = sshll.u32 %s3924_s23, 4  ;;  %s3799_s18 = int_to_ptr.vmem [resolvable:$false] %s3798_s18 }
  0x2b   : > { %s3800_s19 = scalar_lea.vmem %s3799_s18, 512  ;;  %p3801_p9 = scmp.lt.s32.totalorder %s4050_s30, %s3799_s18 }
  0x2c   : > { %p3796_p5 = pnand %p3794_p2, %p3780_p3  ;;  %p3802_p4 = scmp.lt.s32.totalorder %s3800_s19, %s3793_s17 }
  0x2e   : > { %p3797_p11 = pneg %p3796_p5  ;;  %p3803_p7 = por %p3802_p4, %p3801_p9 }
  0x30   : > { %p3804_p10 = pnand %p3803_p7, %p3797_p11 }
  0x32   : > { %3807 = shalt.err (!%p3804_p10)
}
  0x33   : > { %s3925_s12 = smov 128   ;;  %s3926_s11 = smov 8  }
  0x34   : > { %3682 = dma.hbm_to_vmem [thread:$0]  (!%p4054_p0), %s4048_s22, 256, %s4050_s30, %s4059_s10, %s3925_s12, %s3925_s12, %s3926_s11  }
  0x35   : > { %p333_p12 = scmp.lt.s32.totalorder %s3922_s29, 3  ;;  %p5394_p1 = scmp.ge.s32.totalorder %s3922_s29, 1 }
  0x37   : > { %p334_p3 = pnand %p5394_p1, %p333_p12 }
  0x38   : > { %s4091_s20 = sand.u32 (!%p334_p3), 1, %s3906_s25  }
  0x39   : > { %337 = sbr.rel (%p334_p3) target bundleno = 514 (0x202), region = 44  ;;  %s5378_s21 = sshll.u32 (!%p334_p3), %s4091_s20, 4 }
  0x3a   : > { %s340_s17 = scalar_lea.sflag (!%p334_p3), [#allocation3], %s4091_s20  ;;  %s343_s23 = scalar_lea.vmem (!%p334_p3), [#allocation2], %s5378_s21 }
  0x40   : > { %3889 = dma.done.wait (%p4026_p8), %s340_s17, 256  }
  0x41   : > { %3891 = vsyncadd (%p4026_p8), %s340_s17, 4294967040  ;;  %p407_p9 = scmp.lt.s32.totalorder %s3914_s27, 1  ;;  %v3927_v0 = vmov 0   ;;  %vm5385_vm0 = vcmask 261120   ;;  %v440_v1 = vld [vmem:[%s5372_s3] sm:$0xff]  ;;  %v441_v2 = vld [vmem:[%s5372_s3 + $0x8] sm:$0xff] }
  0x42   : > { %3753 = vset.pattern.permute.xlu1 %v3927_v0  ;;  %3752 = vset.pattern.permute.xlu0 %v3927_v0  ;;  %v4120_v3 = vld [vmem:[%s5372_s3 + $0x10] sm:$0xff]  ;;  %v1328_v4 = vand.u32 4294901760, %v440_v1  ;;  %v1331_v5 = vand.u32 4294901760, %v441_v2  ;;  %v4125_v6 = vld [vmem:[%s5372_s3 + $0x18] sm:$0xff]  ;;  %s3934_s19 = smov 120   ;;  %s3935_s13 = smov 8  }
  0x43   : > { %s4103_s22 = scalar_select %p407_p9, %s3914_s27, 1  ;;  %v1334_v7 = vand.u32 4294901760, %v4120_v3  ;;  %v2430_v9 = vld [vmem:[%s343_s23] sm:$0xff]  ;;  %v1337_v10 = vand.u32 4294901760, %v4125_v6  ;;  %v2431_v14 = vld [vmem:[%s343_s23 + $0x8] sm:$0xff] }
  0x44   : > { %v2433_v12 = vsel %vm5385_vm0, %v2430_v9, 0  ;;  %v4131_v16 = vpack.c.bf16 %v1331_v5, %v1328_v4  ;;  %v4142_v22 = vsub.f32 %v440_v1, %v1328_v4  ;;  %v4144_v23 = vsub.f32 %v441_v2, %v1331_v5  ;;  %s3218_s12 = sshll.u32 %s4091_s20, 5  ;;  %s3287_s17 = sshll.u32 %s3914_s27, 9 }
  0x45   : > { %s3284_s30 = sshll.u32 %s4103_s22, 5  ;;  %v4135_v18 = vand.u32 4294901760, %v2433_v12  ;;  %v4138_v20 = vpack.c.bf16 %v1337_v10, %v1334_v7  ;;  %v2436_v27 = vsel %vm5385_vm0, %v2431_v14, 0  ;;  %v4215_v57 = vsub.f32 %v4120_v3, %v1334_v7  ;;  %s3285_s23 = sshll.u32 %s4103_s22, 4 }
  0x46   : > { %s434_s18 = scalar_lea.vmem %s5373_s4, %s3284_s30  ;;  %3524 = vmatprep.subr.bf16.mxu0 %v4131_v16  ;;  %3572 = vmatprep.subr.bf16.mxu1 %v4131_v16  ;;  %v1439_v30 = vand.u32 4294901760, %v4142_v22  ;;  %v1446_v31 = vand.u32 4294901760, %v4144_v23  ;;  %v4163_v32 = vand.u32 4294901760, %v2436_v27  ;;  %s4187_s21 = scalar_lea.vmem %s5369_s0, %s3284_s30  ;;  %v4222_v60 = vsub.f32 %v4125_v6, %v1337_v10 }
  0x47   : > { %v1310_v8 = vld [vmem:[%s434_s18] sm:$0xff]  ;;  %v1311_v13 = vld [vmem:[%s434_s18 + $0x8] sm:$0xff]  ;;  %v1312_v15 = vld [vmem:[%s434_s18 + $0x10] sm:$0xff]  ;;  %v4152_v26 = vsub.f32 %v2433_v12, %v4135_v18  ;;  %3526 = vmatpush3.bf16.msra.mxu0 %v4131_v16  ;;  %3574 = vmatpush3.bf16.msra.mxu1 %v4131_v16  ;;  %v1453_v0 = vand.u32 4294901760, %v4215_v57  ;;  %s424_s8 = scalar_lea.vmem %s5370_s1, %s3285_s23  ;;  %s5191_s11 = scalar_lea.vmem [#allocation5], %s3218_s12 }
  0x48   : > { %v1316_v11 = vsel %vm5385_vm0, %v1310_v8, 0  ;;  %v1319_v19 = vsel %vm5385_vm0, %v1311_v13, 0  ;;  %v1313_v24 = vld [vmem:[%s434_s18 + $0x18] sm:$0xff]  ;;  %v1322_v28 = vsel %vm5385_vm0, %v1312_v15, 0  ;;  %3528 = vmatprep.subr.bf16.mxu0 %v4138_v20  ;;  %3576 = vmatprep.subr.bf16.mxu1 %v4138_v20  ;;  %v1440_v38 = vsub.f32 %v4142_v22, %v1439_v30  ;;  %v446_v53 = vld [vmem:[%s4187_s21 + $0x10] sm:$0xff]  ;;  %v444_v61 = vld [vmem:[%s4187_s21] sm:$0xff]  ;;  %s5253_s23 = scalar_lea.hbm %s5375_s6, %s3287_s17 }
  0x49   : > { %v4133_v17 = vand.u32 4294901760, %v1316_v11  ;;  %v4140_v21 = vand.u32 4294901760, %v1319_v19  ;;  %v2509_v34 = vand.u32 4294901760, %v4152_v26  ;;  %v4169_v35 = vand.u32 4294901760, %v1322_v28  ;;  %v447_v62 = vld [vmem:[%s4187_s21 + $0x18] sm:$0xff]  ;;  %v445_v5 = vld [vmem:[%s4187_s21 + $0x8] sm:$0xff] }
  0x4a   : > { %v1325_v36 = vsel %vm5385_vm0, %v1313_v24, 0  ;;  %v1447_v39 = vsub.f32 %v4144_v23, %v1446_v31  ;;  %v4180_v40 = vsub.f32 %v2436_v27, %v4163_v32  ;;  %v1441_v46 = vand.u32 4294901760, %v1440_v38  ;;  %v2001_v14 = vld [vmem:[%s424_s8 + $0x8] sm:$0xff]  ;;  %v2000_v15 = vld [vmem:[%s424_s8] sm:$0xff]  ;;  %s3015_s5 = sshll.u32 %s5191_s11, 4  ;;  %s3288_s22 = sshll.u32 %s3914_s27, 8  ;;  %s5260_s5 = int_to_ptr.vmem [resolvable:$true] %s3015_s5 }
  0x4b   : > { %v4149_v25 = vsub.f32 %v1316_v11, %v4133_v17  ;;  %v4159_v29 = vsub.f32 %v1319_v19, %v4140_v21  ;;  %v2510_v42 = vsub.f32 %v4152_v26, %v2509_v34  ;;  %v4196_v43 = vsub.f32 %v1322_v28, %v4169_v35  ;;  %3530 = vmatpush3.bf16.msra.mxu0 %v4138_v20  ;;  %s5418_s30 = sshll.u32 %s4091_s20, 4  ;;  %s2995_s18 = scalar_lea.sflag [#allocation4], %s4091_s20 }
  0x4c   : > { %v4198_v44 = vand.u32 4294901760, %v1325_v36  ;;  %3578 = vmatpush3.bf16.msra.mxu1 %v4138_v20  ;;  %v1448_v47 = vand.u32 4294901760, %v1447_v39  ;;  %v2519_v48 = vand.u32 4294901760, %v4180_v40  ;;  %v450_v1 = vcvt.s32.f32 %v446_v53  ;;  %s5271_s8 = scalar_lea.vmem [#allocation6], %s5418_s30  ;;  %p5420_p11 = scmp.ne.s32.totalorder %s5390_s14, 0 }
  0x4d   : > { %v1398_v33 = vand.u32 4294901760, %v4149_v25  ;;  %v1408_v37 = vand.u32 4294901760, %v4159_v29  ;;  %v2511_v50 = vand.u32 4294901760, %v2510_v42  ;;  %v1418_v51 = vand.u32 4294901760, %v4196_v43  ;;  %s3936_s12 = smov [#allocation5]  }
  0x4e   : > { %v4208_v52 = vsub.f32 %v1325_v36, %v4198_v44  ;;  %v3531_v55 = vpack.c.bf16 %v1448_v47, %v1441_v46  ;;  %v2520_v56 = vsub.f32 %v4180_v40, %v2519_v48  ;;  %v1460_v4 = vand.u32 4294901760, %v4222_v60  ;;  %464 = vperm.xlu1 %3753, %v450_v1   ;;  %s3812_s17 = sshll.u32 %s3936_s12, 4  ;;  %s3813_s17 = int_to_ptr.vmem [resolvable:$false] %s3812_s17 }
  0x4f   : > { %v1399_v41 = vsub.f32 %v4149_v25, %v1398_v33  ;;  %v1409_v45 = vsub.f32 %v4159_v29, %v1408_v37  ;;  %3465 = vmatprep.mubr.f32.mxu1 %v2511_v50  ;;  %v1419_v58 = vsub.f32 %v4196_v43, %v1418_v51  ;;  %v1454_v6 = vsub.f32 %v4215_v57, %v1453_v0  ;;  %s3814_s9 = scalar_lea.vmem %s3813_s17, 1024  ;;  %p3815_p13 = scmp.lt.s32.totalorder %s5260_s5, %s3813_s17 }
  0x50   : > { %v1428_v59 = vand.u32 4294901760, %v4208_v52  ;;  %3532 = vmatprep.subr.bf16.mxu0 %v3531_v55  ;;  %v2521_v63 = vand.u32 4294901760, %v2520_v56  ;;  %3580 = vmatprep.subr.bf16.mxu1 %v3531_v55  ;;  %v448_v7 = vcvt.s32.f32 %v444_v61  ;;  %v451_v8 = vcvt.s32.f32 %v447_v62 }
  0x51   : > { %v1400_v49 = vand.u32 4294901760, %v1399_v41  ;;  %v1410_v54 = vand.u32 4294901760, %v1409_v45  ;;  %v1420_v2 = vand.u32 4294901760, %v1419_v58  ;;  %v1461_v10 = vsub.f32 %v4222_v60, %v1460_v4 }
  0x52   : > { %v1429_v3 = vsub.f32 %v4208_v52, %v1428_v59  ;;  %3466 = vmatmul.mubr.f32.vlgmr.msra.gmra.mrb[0].mxu1 %v2521_v63  ;;  %v1455_v11 = vand.u32 4294901760, %v1454_v6  ;;  %454 = vperm.xlu0 %3752, %v448_v7   ;;  %v449_v12 = vcvt.s32.f32 %v445_v5  ;;  %v3539_v24 = vpack.c.bf16 %v4144_v23, %v4142_v22 }
  0x53   : > { %3381 = vmatprep.mubr.f32.mxu0 %v1400_v49  ;;  %3582 = vmatpush3.bf16.msra.mxu1 %v3531_v55  ;;  %v1462_v13 = vand.u32 4294901760, %v1461_v10  ;;  %v2003_v27 = vcvt.s32.f32 %v2001_v14  ;;  %v2002_v28 = vcvt.s32.f32 %v2000_v15  ;;  %v3543_v36 = vpack.c.bf16 %v4222_v60, %v4215_v57 }
  0x54   : > { %3382 = vmatmul.mubr.f32.vlgmr.msra.gmra.mrb[0].mxu0 %v1410_v54  ;;  %v1430_v9 = vand.u32 4294901760, %v1429_v3  ;;  %3476 = vmatprep.mubr.f32.mxu1 %v4135_v18  ;;  %v3555_v38 = vpack.c.bf16 %v1446_v31, %v1439_v30  ;;  %v3559_v22 = vpack.c.bf16 %v1460_v4, %v1453_v0  ;;  %v3928_v1 = vmov 683565275  }
  0x55   : > { %3534 = vmatpush3.bf16.msra.mxu0 %v3531_v55  ;;  %3384 = vmatprep.mubr.f32.mxu0 %v1420_v2  ;;  %v3535_v19 = vpack.c.bf16 %v1462_v13, %v1455_v11  ;;  %v3929_v3 = vmov 2475754826   ;;  %v3930_v5 = vmov 2131351028   ;;  %vm1979_vm0 = vcmask 195584  }
  0x56   : > { %469 = vperm.xlu1 %3753, %v451_v8   ;;  %459 = vperm.xlu0 %3752, %v449_v12   ;;  %v3932_v12 = vmov 920167782  }
  0x57   : > { %3536 = vmatprep.subr.bf16.mxu0 %v3535_v19  ;;  %3584 = vmatprep.subr.bf16.mxu1 %v3535_v19 }
  0x58   : > { %3385 = vmatmul.mubr.f32.gmra.mrb[2].mxu0 %v1430_v9  ;;  %3586 = vmatpush3.bf16.msra.mxu1 %v3535_v19  ;;  %v3931_v9 = vmov 2102212464  }
  0x59   : > { %3395 = vmatprep.mubr.f32.mxu0 %v4133_v17  ;;  %3538 = vmatpush3.bf16.msra.mxu0 %v3535_v19 }
  0x5a   : > { %3540 = vmatprep.subr.bf16.mxu0 %v3539_v24  ;;  %3588 = vmatprep.subr.bf16.mxu1 %v3539_v24 }
  0x5b   : > { %2011 = vperm.xlu1 %3753, %v2003_v27   ;;  %2006 = vperm.xlu0 %3752, %v2002_v28  }
  0x5c   : > { %3396 = vmatmul.mubr.f32.vlgmr.msra.gmra.mrb[0].mxu0 %v4140_v21  ;;  %3477 = vmatmul.mubr.f32.vlgmr.msra.gmra.mrb[0].mxu1 %v4163_v32 }
  0x5d   : > { %3542 = vmatpush3.bf16.msra.mxu0 %v3539_v24  ;;  %3590 = vmatpush3.bf16.msra.mxu1 %v3539_v24 }
  0x5e   : > { %3398 = vmatprep.mubr.f32.mxu0 %v4169_v35  ;;  %3544 = vmatprep.subr.bf16.mxu0 %v3543_v36 }
  0x5f   : > { %3592 = vmatprep.subr.bf16.mxu1 %v3543_v36  ;;  %3487 = vmatprep.mubr.f32.mxu1 %v4152_v26 }
  0x60   : > { %3399 = vmatmul.mubr.f32.gmra.mrb[2].mxu0 %v4198_v44 }
  0x61   : > { %3546 = vmatpush3.bf16.msra.mxu0 %v3543_v36  ;;  %3594 = vmatpush3.bf16.msra.mxu1 %v3543_v36 }
  0x62   : > { %3409 = vmatprep.mubr.f32.mxu0 %v4149_v25  ;;  %3548 = vmatprep.subr.bf16.mxu0 %v4131_v16 }
  0x63   : > { %3596 = vmatprep.subr.bf16.mxu1 %v4131_v16 }
  0x64   : > { %3410 = vmatmul.mubr.f32.vlgmr.msra.gmra.mrb[0].mxu0 %v4159_v29  ;;  %3488 = vmatmul.mubr.f32.vlgmr.msra.gmra.mrb[0].mxu1 %v4180_v40 }
  0x65   : > { %3550 = vmatpush3.bf16.msra.mxu0 %v4131_v16  ;;  %3598 = vmatpush3.bf16.msra.mxu1 %v4131_v16 }
  0x66   : > { %3412 = vmatprep.mubr.f32.mxu0 %v4196_v43  ;;  %3552 = vmatprep.subr.bf16.mxu0 %v4138_v20 }
  0x67   : > { %3600 = vmatprep.subr.bf16.mxu1 %v4138_v20  ;;  %3498 = vmatprep.mubr.f32.mxu1 %v2509_v34 }
  0x68   : > { %3413 = vmatmul.mubr.f32.gmra.mrb[2].mxu0 %v4208_v52 }
  0x69   : > { %3554 = vmatpush3.bf16.msra.mxu0 %v4138_v20  ;;  %3602 = vmatpush3.bf16.msra.mxu1 %v4138_v20 }
  0x6a   : > { %3423 = vmatprep.mubr.f32.mxu0 %v1398_v33  ;;  %3556 = vmatprep.subr.bf16.mxu0 %v3555_v38 }
  0x6b   : > { %3604 = vmatprep.subr.bf16.mxu1 %v3555_v38 }
  0x6c   : > { %3424 = vmatmul.mubr.f32.vlgmr.msra.gmra.mrb[0].mxu0 %v1408_v37  ;;  %3499 = vmatmul.mubr.f32.vlgmr.msra.gmra.mrb[0].mxu1 %v2519_v48 }
  0x6d   : > { %3558 = vmatpush3.bf16.msra.mxu0 %v3555_v38  ;;  %3606 = vmatpush3.bf16.msra.mxu1 %v3555_v38 }
  0x6e   : > { %3426 = vmatprep.mubr.f32.mxu0 %v1418_v51  ;;  %3560 = vmatprep.subr.bf16.mxu0 %v3559_v22 }
  0x6f   : > { %3608 = vmatprep.subr.bf16.mxu1 %v3559_v22  ;;  %3509 = vmatprep.mubr.f32.mxu1 %v4135_v18 }
  0x70   : > { %3427 = vmatmul.mubr.f32.gmra.mrb[2].mxu0 %v1428_v59 }
  0x71   : > { %3562 = vmatpush3.bf16.msra.mxu0 %v3559_v22  ;;  %3610 = vmatpush3.bf16.msra.mxu1 %v3559_v22 }
  0x72   : > { %3437 = vmatprep.mubr.f32.mxu0 %v4133_v17  ;;  %3564 = vmatprep.subr.bf16.mxu0 %v4131_v16 }
  0x73   : > { %3612 = vmatprep.subr.bf16.mxu1 %v4131_v16 }
  0x74   : > { %3438 = vmatmul.mubr.f32.vlgmr.msra.gmra.mrb[0].mxu0 %v4140_v21  ;;  %3510 = vmatmul.mubr.f32.vlgmr.msra.gmra.mrb[0].mxu1 %v4163_v32 }
  0x75   : > { %3566 = vmatpush3.bf16.msra.mxu0 %v4131_v16  ;;  %3614 = vmatpush3.bf16.msra.mxu1 %v4131_v16  ;;  %v4309_v16 = vld [vmem:[%s5371_s2] ss:$0 sm:$0xff] }
  0x76   : > { %3440 = vmatprep.mubr.f32.mxu0 %v4169_v35  ;;  %3568 = vmatprep.subr.bf16.mxu0 %v4138_v20 }
  0x77   : > { %3616 = vmatprep.subr.bf16.mxu1 %v4138_v20  ;;  %3520 = vmatprep.mubr.f32.mxu1 %v4135_v18 }
  0x78   : > { %3441 = vmatmul.mubr.f32.gmra.mrb[2].mxu0 %v4198_v44 }
  0x79   : > { %3570 = vmatpush3.bf16.msra.mxu0 %v4138_v20  ;;  %3618 = vmatpush3.bf16.msra.mxu1 %v4138_v20 }
  0x7a   : > { %3451 = vmatprep.mubr.f32.mxu0 %v4133_v17 }
  0x7c   : > { %3452 = vmatmul.mubr.f32.vlgmr.msra.gmra.mrb[0].mxu0 %v4140_v21  ;;  %3521 = vmatmul.mubr.f32.vlgmr.msra.gmra.mrb[0].mxu1 %v4163_v32 }
  0x7d   : > { %3454 = vmatprep.mubr.f32.mxu0 %v4169_v35 }
  0x80   : > { %3455 = vmatmul.mubr.f32.gmra.mrb[2].mxu0 %v4198_v44 }
  0xcd   : > { %v465_v18 = vpop.permute.xlu1 %464 }
  0xce   : > { %v4312_v25 = vmul.f32 %v4309_v16, %v465_v18  ;;  %v3933_v18 = vmov 1326507024  }
  0xd0   : > { %v691_v20 = vand.u32 2139095040, %v4312_v25  ;;  %v5380_v37 = vand.u32 2147483647, %v4312_v25 }
  0xd1   : > { %v455_v23 = vpop.permute.xlu0 %454 }
  0xd2   : > { %v4315_v17 = vmul.f32 %v4309_v16, %v455_v23  ;;  %v692_v26 = vshrl.u32 %v691_v20, 23  ;;  %v695_v43 = vand.u32 8388607, %v5380_v37 }
  0xd4   : > { %v485_v21 = vand.u32 2139095040, %v4315_v17  ;;  %v3235_v30 = vadd.s32 4294967169, %v692_v26  ;;  %v5383_v40 = vand.u32 2147483647, %v4315_v17  ;;  %v696_v52 = vor.u32 8388608, %v695_v43 }
  0xd5   : > { %v470_v32 = vpop.permute.xlu1 %469  ;;  %v460_v41 = vpop.permute.xlu0 %459 }
  0xd6   : > { %v486_v29 = vshrl.u32 %v485_v21, 23  ;;  %v4320_v33 = vmul.f32 %v4309_v16, %v470_v32  ;;  %v698_v34 = vadd.s32 1, %v3235_v30  ;;  %v4326_v42 = vmul.f32 %v4309_v16, %v460_v41 }
  0xd7   : > { %v489_v47 = vand.u32 8388607, %v5383_v40  ;;  %v4340_v59 = vshll.u32 %v696_v52, 8 }
  0xd8   : > { %v3227_v31 = vadd.s32 4294967169, %v486_v29  ;;  %v794_v39 = vand.u32 2139095040, %v4320_v33  ;;  %vm699_vm1 = vcmp.gt.s32.totalorder %v698_v34, 0  ;;  %v5382_v48 = vand.u32 2147483647, %v4320_v33 }
  0xd9   : > { %v700_v44 = vsel %vm699_vm1, %v698_v34, 0  ;;  %v588_v49 = vand.u32 2139095040, %v4326_v42  ;;  %v490_v54 = vor.u32 8388608, %v489_v47  ;;  %v5381_v0 = vand.u32 2147483647, %v4326_v42 }
  0xda   : > { %v492_v35 = vadd.s32 1, %v3227_v31  ;;  %v795_v46 = vshrl.u32 %v794_v39, 23  ;;  %v702_v50 = vand.u32 31, %v700_v44  ;;  %v798_v55 = vand.u32 8388607, %v5382_v48  ;;  %v2012_v21 = vpop.permute.xlu1 %2011 }
  0xdb   : > { %v589_v56 = vshrl.u32 %v588_v49, 23  ;;  %v4342_v61 = vshrl.u32 %v700_v44, 5  ;;  %v4344_v62 = vshll.u32 %v490_v54, 8  ;;  %v4389_v44 = vmul.f32 %v4309_v16, %v2012_v21 }
  0xdc   : > { %vm493_vm2 = vcmp.gt.s32.totalorder %v492_v35, 0  ;;  %v3239_v53 = vadd.s32 4294967169, %v795_v46  ;;  %v4336_v57 = vsub.s32 32, %v702_v50  ;;  %v799_v63 = vor.u32 8388608, %v798_v55 }
  0xdd   : > { %v494_v45 = vsel %vm493_vm2, %v492_v35, 0  ;;  %v705_v2 = vshll.u32 %v3928_v1, %v702_v50  ;;  %v708_v4 = vshll.u32 %v3929_v3, %v702_v50  ;;  %v711_v6 = vshll.u32 %v3930_v5, %v702_v50 }
  0xde   : > { %v496_v51 = vand.u32 31, %v494_v45  ;;  %v801_v60 = vadd.s32 1, %v3239_v53  ;;  %v3231_v7 = vadd.s32 4294967169, %v589_v56  ;;  %v706_v8 = vshrl.u32 %v3929_v3, %v4336_v57 }
  0xdf   : > { %v714_v10 = vshll.u32 %v3931_v9, %v702_v50  ;;  %v709_v14 = vshrl.u32 %v3930_v5, %v4336_v57  ;;  %v4358_v15 = vshrl.u32 %v494_v45, 5  ;;  %v715_v26 = vshrl.u32 %v3932_v12, %v4336_v57 }
  0xe0   : > { %v4338_v58 = vsub.s32 32, %v496_v51  ;;  %v508_v11 = vshll.u32 %v3931_v9, %v496_v51  ;;  %v499_v19 = vshll.u32 %v3928_v1, %v496_v51  ;;  %vm802_vm3 = vcmp.gt.s32.totalorder %v801_v60, 0 }
  0xe1   : > { %v502_v27 = vshll.u32 %v3929_v3, %v496_v51  ;;  %v505_v36 = vshll.u32 %v3930_v5, %v496_v51  ;;  %v511_v22 = vshll.u32 %v3932_v12, %v496_v51  ;;  %v595_v20 = vadd.s32 1, %v3231_v7 }
  0xe2   : > { %v509_v13 = vshrl.u32 %v3932_v12, %v4338_v58  ;;  %v500_v24 = vshrl.u32 %v3929_v3, %v4338_v58  ;;  %v503_v28 = vshrl.u32 %v3930_v5, %v4338_v58  ;;  %v506_v38 = vshrl.u32 %v3931_v9, %v4338_v58 }
  0xe3   : > { %v512_v23 = vshrl.u32 %v3933_v18, %v4338_v58  ;;  %v4375_v29 = vshll.u32 %v3932_v12, %v702_v50  ;;  %v803_v31 = vsel %vm802_vm3, %v801_v60, 0  ;;  %v4377_v32 = vor.u32 %v706_v8, %v705_v2 }
  0xe4   : > { %v510_v30 = vor.u32 %v509_v13, %v508_v11  ;;  %v712_v34 = vshrl.u32 %v3931_v9, %v4336_v57  ;;  %v4383_v35 = vshrl.u32 %v3933_v18, %v4336_v57  ;;  %vm517_vm4 = vcmp.lt.s32.totalorder %v4358_v15, 4 }
  0xe5   : > { %v4386_v39 = vor.u32 %v709_v14, %v708_v4  ;;  %v501_v41 = vor.u32 %v500_v24, %v499_v19  ;;  %v504_v43 = vor.u32 %v503_v28, %v502_v27  ;;  %v507_v45 = vor.u32 %v506_v38, %v505_v36 }
  0xe6   : > { %v513_v46 = vor.u32 %v512_v23, %v511_v22  ;;  %v805_v47 = vand.u32 31, %v803_v31  ;;  %vm596_vm5 = vcmp.gt.s32.totalorder %v595_v20, 0  ;;  %v4391_v49 = vor.u32 %v715_v26, %v714_v10 }
  0xe7   : > { %vm514_vm6 = vcmp.lt.s32.totalorder %v4358_v15, 1  ;;  %vm516_vm7 = vcmp.lt.s32.totalorder %v4358_v15, 3  ;;  %v523_v50 = vsel %vm517_vm4, %v510_v30, 920167782  ;;  %vm720_vm8 = vcmp.lt.s32.totalorder %v4342_v61, 1 }
  0xe8   : > { %vm723_vm9 = vcmp.lt.s32.totalorder %v4342_v61, 4  ;;  %v4399_v51 = vshll.u32 %v799_v63, 8  ;;  %v4403_v52 = vand.u32 8388607, %v5381_v0  ;;  %v4405_v53 = vor.u32 %v712_v34, %v711_v6 }
  0xe9   : > { %vm515_vm10 = vcmp.lt.s32.totalorder %v4358_v15, 2  ;;  %v597_v54 = vsel %vm596_vm5, %v595_v20, 0  ;;  %v2122_v55 = vand.u32 2139095040, %v4389_v44  ;;  %v522_v56 = vsel %vm514_vm6, %v501_v41, %v504_v43 }
  0xea   : > { %v524_v60 = vsel %vm516_vm7, %v507_v45, %v523_v50  ;;  %v527_v63 = vsel %vm517_vm4, %v513_v46, 1326507024  ;;  %v4415_v2 = vsub.s32 32, %v805_v47  ;;  %v719_v4 = vor.u32 %v4383_v35, %v4375_v29 }
  0xeb   : > { %v4422_v6 = vsel %vm723_vm9, %v4405_v53, 2102212464  ;;  %v4428_v7 = vsel %vm720_vm8, %v4377_v32, %v4386_v39  ;;  %v4433_v8 = vsel %vm723_vm9, %v4391_v49, 920167782  ;;  %v498_v10 = vshrl.u32 %v3928_v1, %v4338_v58 }
  0xec   : > { %v519_v11 = vsel %vm517_vm4, %v507_v45, 2102212464  ;;  %v526_v13 = vsel %vm514_vm6, %v504_v43, %v507_v45  ;;  %v599_v14 = vand.u32 31, %v597_v54  ;;  %v4443_v19 = vsel %vm515_vm10, %v522_v56, %v524_v60 }
  0xed   : > { %v528_v24 = vsel %vm516_vm7, %v510_v30, %v527_v63  ;;  %v4447_v27 = vshrl.u32 %v803_v31, 5  ;;  %v2123_v28 = vshrl.u32 %v2122_v55, 23  ;;  %v808_v36 = vshll.u32 %v3928_v1, %v805_v47  ;;  %v2007_v30 = vpop.permute.xlu0 %2006 }
  0xee   : > { %v809_v58 = vshrl.u32 %v3929_v3, %v4415_v2  ;;  %v817_v38 = vshll.u32 %v3931_v9, %v805_v47  ;;  %v818_v22 = vshrl.u32 %v3932_v12, %v4415_v2  ;;  %v811_v23 = vshll.u32 %v3929_v3, %v805_v47 }
  0xef   : > { %v812_v20 = vshrl.u32 %v3930_v5, %v4415_v2  ;;  %v814_v21 = vshll.u32 %v3930_v5, %v805_v47  ;;  %v815_v26 = vshrl.u32 %v3931_v9, %v4415_v2  ;;  %v518_v31 = vsel %vm514_vm6, %v498_v10, %v501_v41 }
  0xf0   : > { %v820_v34 = vshll.u32 %v3932_v12, %v805_v47  ;;  %v821_v45 = vshrl.u32 %v3933_v18, %v4415_v2  ;;  %v4466_v46 = vsub.s32 32, %v599_v14  ;;  %v520_v50 = vsel %vm516_vm7, %v504_v43, %v519_v11 }
  0xf1   : > { %v4472_v55 = vmul.u32.u64.low %v4344_v62, %v4443_v19  ;;  %v4473_v56 = vmul.u32.u64.high %v4344_v62, %v4443_v19, %v4472_v55  ;;  %v3263_v60 = vadd.s32 4294967169, %v2123_v28  ;;  %v529_v41 = vsel %vm515_vm10, %v526_v13, %v528_v24 }
  0xf2   : > { %v4478_v63 = vor.u32 %v809_v58, %v808_v36  ;;  %v819_v47 = vor.u32 %v818_v22, %v817_v38  ;;  %v4481_v10 = vmul.f32 %v4309_v16, %v2007_v30  ;;  %v4483_v37 = vor.u32 %v812_v20, %v811_v23 }
  0xf3   : > { %v816_v0 = vor.u32 %v815_v26, %v814_v21  ;;  %vm823_vm11 = vcmp.lt.s32.totalorder %v4447_v27, 1  ;;  %vm826_vm12 = vcmp.lt.s32.totalorder %v4447_v27, 4  ;;  %v822_v43 = vor.u32 %v821_v45, %v820_v34 }
  0xf4   : > { %vm825_vm13 = vcmp.lt.s32.totalorder %v4447_v27, 3  ;;  %v611_v11 = vshll.u32 %v3931_v9, %v599_v14  ;;  %v612_v13 = vshrl.u32 %v3932_v12, %v4466_v46  ;;  %v4491_v19 = vshrl.u32 %v597_v54, 5 }
  0xf5   : > { %v614_v16 = vshll.u32 %v3932_v12, %v599_v14  ;;  %v615_v24 = vshrl.u32 %v3933_v18, %v4466_v46  ;;  %v2129_v28 = vadd.s32 1, %v3263_v60  ;;  %v832_v36 = vsel %vm826_vm12, %v819_v47, 920167782 }
  0xf6   : > { %v602_v58 = vshll.u32 %v3928_v1, %v599_v14  ;;  %v605_v38 = vshll.u32 %v3929_v3, %v599_v14  ;;  %v2019_v22 = vand.u32 2139095040, %v4481_v10  ;;  %v603_v23 = vshrl.u32 %v3929_v3, %v4466_v46 }
  0xf7   : > { %v606_v54 = vshrl.u32 %v3930_v5, %v4466_v46  ;;  %v608_v20 = vshll.u32 %v3930_v5, %v599_v14  ;;  %v609_v21 = vshrl.u32 %v3931_v9, %v4466_v46  ;;  %vm722_vm14 = vcmp.lt.s32.totalorder %v4342_v61, 3 }
  0xf8   : > { %v4510_v26 = vmul.u32.u64.low %v4344_v62, %v529_v41  ;;  %v4511_v30 = vmul.u32.u64.high %v4344_v62, %v529_v41, %v4510_v26  ;;  %v836_v34 = vsel %vm826_vm12, %v822_v43, 1326507024  ;;  %v613_v45 = vor.u32 %v612_v13, %v611_v11 }
  0xf9   : > { %vm824_vm15 = vcmp.lt.s32.totalorder %v4447_v27, 2  ;;  %v616_v60 = vor.u32 %v615_v24, %v614_v16  ;;  %vm620_vm1 = vcmp.lt.s32.totalorder %v4491_v19, 4  ;;  %vm2130_vm2 = vcmp.gt.s32.totalorder %v2129_v28, 0 }
  0xfa   : > { %v831_v14 = vsel %vm823_vm11, %v4478_v63, %v4483_v37  ;;  %v833_v48 = vsel %vm825_vm13, %v816_v0, %v832_v36  ;;  %v835_v41 = vsel %vm823_vm11, %v4483_v37, %v816_v0  ;;  %v2020_v43 = vshrl.u32 %v2019_v22, 23 }
  0xfb   : > { %v837_v11 = vsel %vm825_vm13, %v819_v47, %v836_v34  ;;  %v604_v13 = vor.u32 %v603_v23, %v602_v58  ;;  %v607_v16 = vor.u32 %v606_v54, %v605_v38  ;;  %v610_v24 = vor.u32 %v609_v21, %v608_v20 }
  0xfc   : > { %vm617_vm3 = vcmp.lt.s32.totalorder %v4491_v19, 1  ;;  %vm619_vm4 = vcmp.lt.s32.totalorder %v4491_v19, 3  ;;  %v626_v26 = vsel %vm620_vm1, %v613_v45, 920167782  ;;  %v2131_v40 = vsel %vm2130_vm2, %v2129_v28, 0 }
  0xfd   : > { %v733_v36 = vsel %vm723_vm9, %v719_v4, 1326507024  ;;  %v834_v47 = vsel %vm824_vm15, %v831_v14, %v833_v48  ;;  %v593_v58 = vor.u32 8388608, %v4403_v52  ;;  %v630_v38 = vsel %vm620_vm1, %v616_v60, 1326507024 }
  0xfe   : > { %v4544_v22 = vsel %vm515_vm10, %v518_v31, %v520_v50  ;;  %v807_v28 = vshrl.u32 %v3928_v1, %v4415_v2  ;;  %v838_v29 = vsel %vm824_vm15, %v835_v41, %v837_v11  ;;  %v3259_v35 = vadd.s32 4294967169, %v2020_v43 }
  0xff   : > { %vm618_vm5 = vcmp.lt.s32.totalorder %v4491_v19, 2  ;;  %v625_v48 = vsel %vm617_vm3, %v604_v13, %v607_v16  ;;  %v627_v52 = vsel %vm619_vm4, %v610_v24, %v626_v26  ;;  %v2133_v4 = vand.u32 31, %v2131_v40 }
 0x100   : > { %v4556_v15 = vmul.u32.u64.low %v4399_v51, %v834_v47  ;;  %v4557_v31 = vmul.u32.u64.high %v4399_v51, %v834_v47, %v4556_v15  ;;  %v629_v2 = vsel %vm617_vm3, %v607_v16, %v610_v24  ;;  %v631_v50 = vsel %vm619_vm4, %v613_v45, %v630_v38 }
 0x101   : > { %vm721_vm6 = vcmp.lt.s32.totalorder %v4342_v61, 2  ;;  %v828_v23 = vsel %vm826_vm12, %v816_v0, 2102212464  ;;  %v4568_v54 = vmul.u32.u64.low %v4399_v51, %v838_v29  ;;  %v4569_v20 = vmul.u32.u64.high %v4399_v51, %v838_v29, %v4568_v54 }
 0x102   : > { %v4571_v21 = vshll.u32 %v593_v58, 8  ;;  %v732_v34 = vsel %vm720_vm8, %v4386_v39, %v4405_v53  ;;  %v540_v60 = vadd.s32 1, %v4473_v56  ;;  %v628_v45 = vsel %vm618_vm5, %v625_v48, %v627_v52 }
 0x103   : > { %v2026_v14 = vadd.s32 1, %v3259_v35  ;;  %v4584_v0 = vsel %vm722_vm14, %v4405_v53, %v4433_v8  ;;  %vm539_vm7 = vc.u32 %v4511_v30, %v4472_v55  ;;  %v632_v41 = vsel %vm618_vm5, %v629_v2, %v631_v50 }
 0x104   : > { %v4590_v43 = vsub.s32 32, %v2133_v4  ;;  %v734_v11 = vsel %vm722_vm14, %v4391_v49, %v733_v36  ;;  %v537_v26 = vmul.u32 %v4344_v62, %v4544_v22  ;;  %v827_v53 = vsel %vm823_vm11, %v807_v28, %v4478_v63 }
 0x105   : > { %v829_v8 = vsel %vm825_vm13, %v4483_v37, %v828_v23  ;;  %v601_v47 = vshrl.u32 %v3928_v1, %v4466_v46  ;;  %v4606_v58 = vmul.u32.u64.low %v4571_v21, %v628_v45  ;;  %v4607_v38 = vmul.u32.u64.high %v4571_v21, %v628_v45, %v4606_v58 }
 0x106   : > { %v2119_v49 = vand.u32 2147483647, %v4389_v44  ;;  %v541_v62 = vsel %vm539_vm7, %v540_v60, %v4473_v56  ;;  %v4613_v36 = vmul.u32.u64.low %v4571_v21, %v632_v41  ;;  %v4614_v22 = vmul.u32.u64.high %v4571_v21, %v632_v41, %v4613_v36 }
 0x107   : > { %vm2027_vm9 = vcmp.gt.s32.totalorder %v2026_v14, 0  ;;  %v830_v37 = vsel %vm824_vm15, %v827_v53, %v829_v8  ;;  %v622_v46 = vsel %vm620_vm1, %v610_v24, 2102212464  ;;  %v2145_v63 = vshll.u32 %v3931_v9, %v2133_v4 }
 0x108   : > { %v2146_v28 = vshrl.u32 %v3932_v12, %v4590_v43  ;;  %v849_v29 = vadd.s32 1, %v4557_v31  ;;  %v4624_v35 = vshrl.u32 %v2131_v40, 5  ;;  %v2148_v56 = vshll.u32 %v3932_v12, %v2133_v4 }
 0x109   : > { %v2149_v48 = vshrl.u32 %v3933_v18, %v4590_v43  ;;  %vm848_vm10 = vc.u32 %v4569_v20, %v4556_v15  ;;  %v621_v27 = vsel %vm617_vm3, %v601_v47, %v604_v13  ;;  %v2126_v24 = vand.u32 8388607, %v2119_v49 }
 0x10a   : > { %v2028_v52 = vsel %vm2027_vm9, %v2026_v14, 0  ;;  %v623_v2 = vsel %vm619_vm4, %v607_v16, %v622_v46  ;;  %v2136_v40 = vshll.u32 %v3928_v1, %v2133_v4  ;;  %v2137_v50 = vshrl.u32 %v3929_v3, %v4590_v43 }
 0x10b   : > { %v2139_v23 = vshll.u32 %v3929_v3, %v2133_v4  ;;  %v2140_v54 = vshrl.u32 %v3930_v5, %v4590_v43  ;;  %v2142_v60 = vshll.u32 %v3930_v5, %v2133_v4  ;;  %v2143_v13 = vshrl.u32 %v3931_v9, %v4590_v43 }
 0x10c   : > { %v2147_v45 = vor.u32 %v2146_v28, %v2145_v63  ;;  %v4648_v14 = vsel %vm721_vm6, %v732_v34, %v734_v11  ;;  %v2150_v16 = vor.u32 %v2149_v48, %v2148_v56  ;;  %vm2154_vm11 = vcmp.lt.s32.totalorder %v4624_v35, 4 }
 0x10d   : > { %v2030_v41 = vand.u32 31, %v2028_v52  ;;  %v4651_v53 = vadd.s32 %v541_v62, %v537_v26  ;;  %v846_v8 = vmul.u32 %v4399_v51, %v830_v37  ;;  %v850_v4 = vsel %vm848_vm10, %v849_v29, %v4557_v31 }
 0x10e   : > { %v2127_v47 = vor.u32 8388608, %v2126_v24  ;;  %v624_v36 = vsel %vm618_vm5, %v621_v27, %v623_v2  ;;  %vm642_vm12 = vc.u32 %v4614_v22, %v4606_v58  ;;  %v643_v34 = vadd.s32 1, %v4607_v38 }
 0x10f   : > { %v4663_v11 = vor.u32 %v2137_v50, %v2136_v40  ;;  %v4665_v26 = vor.u32 %v2140_v54, %v2139_v23  ;;  %v4667_v62 = vor.u32 %v2143_v13, %v2142_v60  ;;  %vm2151_vm13 = vcmp.lt.s32.totalorder %v4624_v35, 1 }
 0x110   : > { %v2160_v51 = vsel %vm2154_vm11, %v2147_v45, 920167782  ;;  %v4678_v37 = vshrl.u32 %v3928_v1, %v4336_v57  ;;  %vm2153_vm15 = vcmp.lt.s32.totalorder %v4624_v35, 3  ;;  %v2164_v46 = vsel %vm2154_vm11, %v2150_v16, 1326507024 }
 0x111   : > { %v4683_v63 = vsub.s32 32, %v2030_v41  ;;  %v731_v57 = vsel %vm721_vm6, %v4428_v7, %v4584_v0  ;;  %v4697_v56 = vmul.u32.u64.low %v4340_v59, %v4648_v14  ;;  %v4698_v48 = vmul.u32.u64.high %v4340_v59, %v4648_v14, %v4697_v56 }
 0x112   : > { %v640_v27 = vmul.u32 %v4571_v21, %v624_v36  ;;  %v543_v24 = vadd.s32 536870912, %v4651_v53  ;;  %v4704_v2 = vadd.s32 %v850_v4, %v846_v8  ;;  %v644_v40 = vsel %vm642_vm12, %v643_v34, %v4607_v38 }
 0x113   : > { %vm2152_vm1 = vcmp.lt.s32.totalorder %v4624_v35, 2  ;;  %v2159_v7 = vsel %vm2151_vm13, %v4663_v11, %v4665_v26  ;;  %v2161_v21 = vsel %vm2153_vm15, %v4667_v62, %v2160_v51  ;;  %v2163_v0 = vsel %vm2151_vm13, %v4665_v26, %v4667_v62 }
 0x114   : > { %v2165_v50 = vsel %vm2153_vm15, %v2147_v45, %v2164_v46  ;;  %v4726_v23 = vshll.u32 %v2127_v47, 8  ;;  %v2016_v54 = vand.u32 2147483647, %v4481_v10  ;;  %v2042_v60 = vshll.u32 %v3931_v9, %v2030_v41 }
 0x115   : > { %v2043_v13 = vshrl.u32 %v3932_v12, %v4683_v63  ;;  %v4736_v16 = vadd.s32 %v644_v40, %v640_v27  ;;  %v4738_v45 = vshrl.u32 %v2028_v52, 5  ;;  %v2045_v8 = vshll.u32 %v3932_v12, %v2030_v41 }
 0x116   : > { %v2046_v4 = vshrl.u32 %v3933_v18, %v4683_v63  ;;  %v2162_v47 = vsel %vm2152_vm1, %v2159_v7, %v2161_v21  ;;  %v2166_v36 = vsel %vm2152_vm1, %v2163_v0, %v2165_v50  ;;  %v2033_v34 = vshll.u32 %v3928_v1, %v2030_v41 }
 0x117   : > { %v2036_v51 = vshll.u32 %v3929_v3, %v2030_v41  ;;  %v2034_v52 = vshrl.u32 %v3929_v3, %v4683_v63  ;;  %v2037_v12 = vshrl.u32 %v3930_v5, %v4683_v63  ;;  %v2039_v18 = vshll.u32 %v3930_v5, %v2030_v41 }
 0x118   : > { %v2040_v46 = vshrl.u32 %v3931_v9, %v4683_v63  ;;  %v4759_v56 = vmul.u32.u64.low %v4340_v59, %v731_v57  ;;  %v4760_v27 = vmul.u32.u64.high %v4340_v59, %v731_v57, %v4759_v56  ;;  %v4763_v40 = vshrl.u32 %v543_v24, 30 }
 0x119   : > { %v2044_v7 = vor.u32 %v2043_v13, %v2042_v60  ;;  %v852_v3 = vadd.s32 536870912, %v4704_v2  ;;  %v2023_v21 = vand.u32 8388607, %v2016_v54  ;;  %v2047_v5 = vor.u32 %v2046_v4, %v2045_v8 }
 0x11a   : > { %vm2051_vm2 = vcmp.lt.s32.totalorder %v4738_v45, 4  ;;  %v4774_v9 = vmul.u32.u64.low %v4726_v23, %v2166_v36  ;;  %v4775_v41 = vmul.u32.u64.high %v4726_v23, %v2166_v36, %v4774_v9  ;;  %v646_v0 = vadd.s32 536870912, %v4736_v16 }
 0x11b   : > { %v4778_v57 = vmul.u32.u64.low %v4726_v23, %v2162_v47  ;;  %v4779_v24 = vmul.u32.u64.high %v4726_v23, %v2162_v47, %v4778_v57  ;;  %v2035_v50 = vor.u32 %v2034_v52, %v2033_v34  ;;  %v2038_v60 = vor.u32 %v2037_v12, %v2036_v51 }
 0x11c   : > { %v2041_v13 = vor.u32 %v2040_v46, %v2039_v18  ;;  %v2135_v8 = vshrl.u32 %v3928_v1, %v4590_v43  ;;  %vm2048_vm3 = vcmp.lt.s32.totalorder %v4738_v45, 1  ;;  %vm2050_vm4 = vcmp.lt.s32.totalorder %v4738_v45, 3 }
 0x11d   : > { %v2057_v4 = vsel %vm2051_vm2, %v2044_v7, 920167782  ;;  %v4791_v47 = vshrl.u32 %v852_v3, 30  ;;  %v2156_v36 = vsel %vm2154_vm11, %v4667_v62, 2102212464  ;;  %v2024_v34 = vor.u32 8388608, %v2023_v21 }
 0x11e   : > { %v2061_v43 = vsel %vm2051_vm2, %v2047_v5, 1326507024  ;;  %v724_v51 = vsel %vm720_vm8, %v4678_v37, %v4377_v32  ;;  %v726_v52 = vsel %vm722_vm14, %v4386_v39, %v4422_v6  ;;  %v545_v12 = vshll.u32 %v4763_v40, 30 }
 0x11f   : > { %v4809_v62 = vshrl.u32 %v646_v0, 30  ;;  %vm2049_vm5 = vcmp.lt.s32.totalorder %v4738_v45, 2  ;;  %v2056_v18 = vsel %vm2048_vm3, %v2035_v50, %v2038_v60  ;;  %v2058_v46 = vsel %vm2050_vm4, %v2041_v13, %v2057_v4 }
 0x120   : > { %v2155_v32 = vsel %vm2151_vm13, %v2135_v8, %v4663_v11  ;;  %v2157_v39 = vsel %vm2153_vm15, %v4665_v26, %v2156_v36  ;;  %v2060_v6 = vsel %vm2048_vm3, %v2038_v60, %v2041_v13  ;;  %v2062_v37 = vsel %vm2050_vm4, %v2044_v7, %v2061_v43 }
 0x121   : > { %v727_v3 = vsel %vm721_vm6, %v724_v51, %v726_v52  ;;  %v746_v21 = vadd.s32 1, %v4760_v27  ;;  %v854_v11 = vshll.u32 %v4791_v47, 30  ;;  %v2064_v5 = vshll.u32 %v2024_v34, 8 }
 0x122   : > { %vm745_vm8 = vc.u32 %v4698_v48, %v4759_v56  ;;  %v2059_v26 = vsel %vm2049_vm5, %v2056_v18, %v2058_v46  ;;  %v4839_v7 = vsub.s32 %v4651_v53, %v545_v12  ;;  %v2158_v61 = vsel %vm2152_vm1, %v2155_v32, %v2157_v39 }
 0x123   : > { %v2177_v9 = vadd.s32 1, %v4779_v24  ;;  %v2063_v0 = vsel %vm2049_vm5, %v2060_v6, %v2062_v37  ;;  %v743_v8 = vmul.u32 %v4340_v59, %v727_v3  ;;  %v648_v4 = vshll.u32 %v4809_v62, 30 }
 0x124   : > { %vm2176_vm14 = vc.u32 %v4775_v41, %v4778_v57  ;;  %v747_v53 = vsel %vm745_vm8, %v746_v21, %v4760_v27  ;;  %v4854_v35 = vsub.s32 %v4704_v2, %v854_v11  ;;  %v2174_v59 = vmul.u32 %v4726_v23, %v2158_v61 }
 0x125   : > { %v4856_v36 = vmul.u32.u64.low %v2064_v5, %v2059_v26  ;;  %v4857_v34 = vmul.u32.u64.high %v2064_v5, %v2059_v26, %v4856_v36  ;;  %v2032_v43 = vshrl.u32 %v3928_v1, %v4683_v63  ;;  %v548_v27 = vsub.s32 0, %v4839_v7 }
 0x126   : > { %v4865_v51 = vmul.u32.u64.low %v2064_v5, %v2063_v0  ;;  %v4866_v52 = vmul.u32.u64.high %v2064_v5, %v2063_v0, %v4865_v51  ;;  %v2178_v2 = vsel %vm2176_vm14, %v2177_v9, %v4779_v24  ;;  %v2053_v12 = vsel %vm2051_vm2, %v2041_v13, 2102212464 }
 0x127   : > { %v4873_v18 = vsub.s32 %v4736_v16, %v648_v4  ;;  %v748_v46 = vadd.s32 %v747_v53, %v743_v8  ;;  %v857_v32 = vsub.s32 0, %v4854_v35  ;;  %v2179_v23 = vadd.s32 %v2178_v2, %v2174_v59 }
 0x128   : > { %v2052_v1 = vsel %vm2048_vm3, %v2032_v43, %v2035_v50  ;;  %v2054_v63 = vsel %vm2050_vm4, %v2038_v60, %v2053_v12  ;;  %v3228_v39 = vmin.u32 %v548_v27, %v4839_v7  ;;  %v2074_v37 = vadd.s32 1, %v4857_v34 }
 0x129   : > { %v651_v24 = vsub.s32 0, %v4873_v18  ;;  %v749_v6 = vadd.s32 536870912, %v748_v46  ;;  %v3240_v13 = vmin.u32 %v857_v32, %v4854_v35  ;;  %v2055_v16 = vsel %vm2049_vm5, %v2052_v1, %v2054_v63 }
 0x12a   : > { %v2180_v3 = vadd.s32 536870912, %v2179_v23  ;;  %vm2073_vm6 = vc.u32 %v4866_v52, %v4856_v36  ;;  %v550_v50 = vclz %v3228_v39  ;;  %v2071_v60 = vmul.u32 %v2064_v5, %v2055_v16 }
 0x12b   : > { %v3232_v21 = vmin.u32 %v651_v24, %v4873_v18  ;;  %v4889_v11 = vshrl.u32 %v749_v6, 30  ;;  %v859_v26 = vclz %v3240_v13  ;;  %v2075_v61 = vsel %vm2073_vm6, %v2074_v37, %v4857_v34 }
 0x12c   : > { %v4892_v9 = vshrl.u32 %v2180_v3, 30  ;;  %v3229_v0 = vadd.s32 4294967294, %v550_v50  ;;  %v2076_v8 = vadd.s32 %v2075_v61, %v2071_v60  ;;  %v538_v13 = vadd.s32 %v4472_v55, %v4511_v30 }
 0x12d   : > { %v653_v45 = vclz %v3232_v21  ;;  %v751_v4 = vshll.u32 %v4889_v11, 30  ;;  %v3241_v53 = vadd.s32 4294967294, %v859_v26  ;;  %v847_v50 = vadd.s32 %v4556_v15, %v4569_v20 }
 0x12e   : > { %v2182_v59 = vshll.u32 %v4892_v9, 30  ;;  %vm3230_vm7 = vcmp.lt.s32.totalorder %v3229_v0, 0  ;;  %v2077_v51 = vadd.s32 536870912, %v2076_v8  ;;  %v641_v55 = vadd.s32 %v4606_v58, %v4614_v22 }
 0x12f   : > { %v3233_v43 = vadd.s32 4294967294, %v653_v45  ;;  %v4896_v27 = vsub.s32 %v748_v46, %v751_v4  ;;  %vm3242_vm9 = vcmp.lt.s32.totalorder %v3241_v53, 0  ;;  %v553_v5 = vsel %vm3230_vm7, 0, %v3229_v0 }
 0x130   : > { %v4898_v2 = vsub.s32 %v2179_v23, %v2182_v59  ;;  %v862_v34 = vsel %vm3242_vm9, 0, %v3241_v53  ;;  %v4900_v12 = vshrl.u32 %v2077_v51, 30  ;;  %v558_v1 = vsub.s32 4294967266, %v553_v5 }
 0x131   : > { %vm3234_vm10 = vcmp.lt.s32.totalorder %v3233_v43, 0  ;;  %v754_v32 = vsub.s32 0, %v4896_v27  ;;  %v867_v39 = vsub.s32 4294967266, %v862_v34  ;;  %v554_v23 = vsub.s32 32, %v553_v5 }
 0x132   : > { %v2185_v63 = vsub.s32 0, %v4898_v2  ;;  %v656_v24 = vsel %vm3234_vm10, 0, %v3233_v43  ;;  %v2079_v6 = vshll.u32 %v4900_v12, 30  ;;  %v559_v16 = vadd.s32 127, %v558_v1 }
 0x133   : > { %v3236_v46 = vmin.u32 %v754_v32, %v4896_v27  ;;  %v661_v37 = vsub.s32 4294967266, %v656_v24  ;;  %v863_v21 = vsub.s32 32, %v862_v34  ;;  %v868_v60 = vadd.s32 127, %v867_v39 }
 0x134   : > { %v3264_v3 = vmin.u32 %v2185_v63, %v4898_v2  ;;  %v4911_v26 = vsub.s32 %v2076_v8, %v2079_v6  ;;  %v555_v0 = vshll.u32 %v4839_v7, %v553_v5  ;;  %v556_v45 = vshrl.u32 %v538_v13, %v554_v23 }
 0x135   : > { %v756_v61 = vclz %v3236_v46  ;;  %v560_v4 = vshll.u32 %v559_v16, 23  ;;  %v657_v30 = vsub.s32 32, %v656_v24  ;;  %v662_v53 = vadd.s32 127, %v661_v37 }
 0x136   : > { %v2187_v59 = vclz %v3264_v3  ;;  %v864_v43 = vshll.u32 %v4854_v35, %v862_v34  ;;  %v865_v51 = vshrl.u32 %v847_v50, %v863_v21  ;;  %v869_v32 = vshll.u32 %v868_v60, 23 }
 0x137   : > { %v2082_v15 = vsub.s32 0, %v4911_v26  ;;  %v3237_v20 = vadd.s32 4294967294, %v756_v61  ;;  %v557_v8 = vor.u32 %v556_v45, %v555_v0  ;;  %v561_v1 = vor.u32 4788187, %v560_v4 }
 0x138   : > { %v658_v63 = vshll.u32 %v4873_v18, %v656_v24  ;;  %v659_v7 = vshrl.u32 %v641_v55, %v657_v30  ;;  %v663_v5 = vshll.u32 %v662_v53, 23  ;;  %v3265_v39 = vadd.s32 4294967294, %v2187_v59 }
 0x139   : > { %v866_v6 = vor.u32 %v865_v51, %v864_v43  ;;  %v870_v46 = vor.u32 4788187, %v869_v32  ;;  %v3260_v58 = vmin.u32 %v2082_v15, %v4911_v26  ;;  %vm3238_vm11 = vcmp.lt.s32.totalorder %v3237_v20, 0 }
 0x13a   : > { %v564_v22 = vcvt.s32.f32 %v557_v8  ;;  %v562_v13 = vand.u32 2147483647, %v561_v1  ;;  %v660_v35 = vor.u32 %v659_v7, %v658_v63  ;;  %v664_v34 = vor.u32 4788187, %v663_v5 }
 0x13b   : > { %vm3266_vm12 = vcmp.lt.s32.totalorder %v3265_v39, 0  ;;  %v871_v23 = vand.u32 2147483647, %v870_v46  ;;  %v873_v16 = vcvt.s32.f32 %v866_v6  ;;  %v759_v37 = vsel %vm3238_vm11, 0, %v3237_v20 }
 0x13c   : > { %v2084_v3 = vclz %v3260_v58  ;;  %v2190_v50 = vsel %vm3266_vm12, 0, %v3265_v39  ;;  %v565_v21 = vmul.f32 %v564_v22, %v562_v13  ;;  %v665_v18 = vand.u32 2147483647, %v664_v34 }
 0x13d   : > { %v667_v24 = vcvt.s32.f32 %v660_v35  ;;  %v764_v60 = vsub.s32 4294967266, %v759_v37  ;;  %v874_v61 = vmul.f32 %v873_v16, %v871_v23  ;;  %v2195_v0 = vsub.s32 4294967266, %v2190_v50 }
 0x13e   : > { %v3261_v45 = vadd.s32 4294967294, %v2084_v3  ;;  %vm484_vm13 = vcmp.lt.s32.totalorder %v4315_v17, 0  ;;  %v566_v4 = vxor.u32 2147483648, %v565_v21  ;;  %v744_v30 = vadd.s32 %v4759_v56, %v4698_v48 }
 0x13f   : > { %v668_v55 = vmul.f32 %v667_v24, %v665_v18  ;;  %v760_v53 = vsub.s32 32, %v759_v37  ;;  %v765_v59 = vadd.s32 127, %v764_v60  ;;  %v875_v43 = vxor.u32 2147483648, %v874_v61 }
 0x140   : > { %v2175_v51 = vadd.s32 %v4778_v57, %v4775_v41  ;;  %v2191_v32 = vsub.s32 32, %v2190_v50  ;;  %v2196_v15 = vadd.s32 127, %v2195_v0  ;;  %vm3262_vm15 = vcmp.lt.s32.totalorder %v3261_v45, 0 }
 0x141   : > { %v5395_v20 = vand.u32 2147483647, %v4315_v17  ;;  %vm793_vm2 = vcmp.lt.s32.totalorder %v4320_v33, 0  ;;  %v567_v48 = vsel %vm484_vm13, %v566_v4, %v565_v21  ;;  %v5398_v56 = vand.u32 2147483647, %v4320_v33 }
 0x142   : > { %vm587_vm4 = vcmp.lt.s32.totalorder %v4326_v42, 0  ;;  %v669_v41 = vxor.u32 2147483648, %v668_v55  ;;  %v761_v57 = vshll.u32 %v4896_v27, %v759_v37  ;;  %v762_v63 = vshrl.u32 %v744_v30, %v760_v53 }
 0x143   : > { %vm4927_vm1 = vcmp.le.f32.partialorder %v5395_v20, 0.7853982  ;;  %vm4936_vm3 = vcmp.le.f32.partialorder %v5398_v56, 0.7853982  ;;  %v766_v7 = vshll.u32 %v765_v59, 23  ;;  %v2087_v5 = vsel %vm3262_vm15, 0, %v3261_v45 }
 0x144   : > { %v876_v39 = vsel %vm793_vm2, %v875_v43, %v874_v61  ;;  %v2192_v6 = vshll.u32 %v4898_v2, %v2190_v50  ;;  %v2193_v46 = vshrl.u32 %v2175_v51, %v2191_v32  ;;  %v2197_v58 = vshll.u32 %v2196_v15, 23 }
 0x145   : > { %v570_v22 = vsel %vm4927_vm1, %v4315_v17, %v567_v48  ;;  %v5401_v13 = vand.u32 2147483647, %v4326_v42  ;;  %v670_v27 = vsel %vm587_vm4, %v669_v41, %v668_v55  ;;  %v2092_v34 = vsub.s32 4294967266, %v2087_v5 }
 0x146   : > { %v763_v23 = vor.u32 %v762_v63, %v761_v57  ;;  %v767_v16 = vor.u32 4788187, %v766_v7  ;;  %v879_v2 = vsel %vm4936_vm3, %v4320_v33, %v876_v39  ;;  %3754 = vcosq.f32 %v570_v22 }
 0x147   : > { %vm4950_vm5 = vcmp.le.f32.partialorder %v5401_v13, 0.7853982  ;;  %v2194_v37 = vor.u32 %v2193_v46, %v2192_v6  ;;  %v2198_v3 = vor.u32 4788187, %v2197_v58  ;;  %3756 = vsinq.f32 %v570_v22 }
 0x148   : > { %v673_v50 = vsel %vm4950_vm5, %v4326_v42, %v670_v27  ;;  %v671_v21 = vsub.s32 4, %v4809_v62  ;;  %3758 = vcosq.f32 %v879_v2  ;;  %v2072_v18 = vadd.s32 %v4856_v36, %v4866_v52 }
 0x149   : > { %v2088_v24 = vsub.s32 32, %v2087_v5  ;;  %v2093_v60 = vadd.s32 127, %v2092_v34  ;;  %v768_v61 = vand.u32 2147483647, %v767_v16  ;;  %v770_v0 = vcvt.s32.f32 %v763_v23 }
 0x14a   : > { %3760 = vsinq.f32 %v879_v2  ;;  %v568_v45 = vsub.s32 4, %v4763_v40  ;;  %v2199_v4 = vand.u32 2147483647, %v2198_v3  ;;  %v2201_v55 = vcvt.s32.f32 %v2194_v37 }
 0x14b   : > { %3762 = vcosq.f32 %v673_v50  ;;  %v672_v30 = vsel %vm587_vm4, %v671_v21, %v4809_v62  ;;  %v2089_v53 = vshll.u32 %v4911_v26, %v2087_v5  ;;  %v2090_v59 = vshrl.u32 %v2072_v18, %v2088_v24 }
 0x14c   : > { %3764 = vsinq.f32 %v673_v50  ;;  %v2094_v43 = vshll.u32 %v2093_v60, 23  ;;  %v877_v36 = vsub.s32 4, %v4791_v47  ;;  %v771_v52 = vmul.f32 %v770_v0, %v768_v61 }
 0x14d   : > { %v569_v51 = vsel %vm484_vm13, %v568_v45, %v4763_v40  ;;  %v2202_v32 = vmul.f32 %v2201_v55, %v2199_v4  ;;  %v4976_v15 = vsel %vm4950_vm5, 0, %v672_v30  ;;  %v2091_v48 = vor.u32 %v2090_v59, %v2089_v53 }
 0x14e   : > { %v2095_v62 = vor.u32 4788187, %v2094_v43  ;;  %v4982_v26 = vsel %vm4927_vm1, 0, %v569_v51  ;;  %v878_v56 = vsel %vm793_vm2, %v877_v36, %v4791_v47  ;;  %v772_v40 = vxor.u32 2147483648, %v771_v52 }
 0x14f   : > { %v4672_v31 = vpop.f32.mrb[0].mxu0  ;;  %v4674_v19 = vpop.f32.mrb[0].mxu1  ;;  %v678_v57 = vand.u32 3, %v4976_v15  ;;  %vm690_vm8 = vcmp.lt.s32.totalorder %v4312_v25, 0  ;;  %v2203_v7 = vxor.u32 2147483648, %v2202_v32  ;;  %v2205_v5 = vsub.s32 4, %v4892_v9 }
 0x150   : > { %v4685_v28 = vpop.f32.mrb[1].mxu1  ;;  %1947 = vrot.lane.b32.xlu1 %v4672_v31, %s3934_s19  ;;  %v4689_v29 = vpop.f32.mrb[1].mxu0  ;;  %vm2121_vm14 = vcmp.lt.s32.totalorder %v4389_v44, 0  ;;  %v575_v8 = vand.u32 3, %v4982_v26  ;;  %v5000_v47 = vsel %vm4936_vm3, 0, %v878_v56  ;;  %v2098_v22 = vcvt.s32.f32 %v2091_v48 }
 0x151   : > { %1945 = vrot.lane.b32.xlu0 %v4689_v29, %s3934_s19  ;;  %v4978_v20 = vpop.eup %3754  ;;  %vm5006_vm6 = vcmp.le.f32.partialorder %v2119_v49, 0.7853982  ;;  %v2096_v58 = vand.u32 2147483647, %v2095_v62  ;;  %v773_v35 = vsel %vm690_vm8, %v772_v40, %v771_v52  ;;  %vm2018_vm7 = vcmp.lt.s32.totalorder %v4481_v10, 0 }
 0x152   : > { %v4987_v41 = vpop.eup %3756  ;;  %vm679_vm9 = vcmp.lt.s32.totalorder %v678_v57, 2  ;;  %v2204_v27 = vsel %vm2121_vm14, %v2203_v7, %v2202_v32  ;;  %vm680_vm10 = vcmp.eq.s32.totalorder %v678_v57, 0  ;;  %v2206_v34 = vsel %vm2121_vm14, %v2205_v5, %v4892_v9 }
 0x153   : > { %v4724_v38 = vpop.f32.mrb[2].mxu0  ;;  %v4990_v63 = vpop.eup %3758  ;;  %v578_v1 = vxor.u32 2147483648, %v4987_v41  ;;  %v884_v49 = vand.u32 3, %v5000_v47  ;;  %vm677_vm11 = vweird.f32 %v4326_v42  ;;  %vm683_vm12 = vcmp.eq.s32.totalorder %v678_v57, 2 }
 0x154   : > { %1959 = vrot.lane.b32.xlu1 %v4672_v31, %s3935_s13  ;;  %v4734_v14 = vpop.f32.mrb[3].mxu0  ;;  %v4994_v39 = vpop.eup %3760  ;;  %vm574_vm13 = vweird.f32 %v4315_v17  ;;  %vm577_vm15 = vcmp.eq.s32.totalorder %v575_v8, 0  ;;  %vm580_vm1 = vcmp.eq.s32.totalorder %v575_v8, 2  ;;  %v581_v23 = vxor.u32 2147483648, %v4978_v20 }
 0x155   : > { %1957 = vrot.lane.b32.xlu0 %v4689_v29, %s3935_s13  ;;  %v5002_v6 = vpop.eup %3762  ;;  %v2099_v16 = vmul.f32 %v2098_v22, %v2096_v58  ;;  %vm5025_vm2 = vcmp.le.f32.partialorder %v2016_v54, 0.7853982  ;;  %v5408_v3 = vand.u32 2147483647, %v4312_v25  ;;  %v2207_v21 = vsel %vm5006_vm6, %v4389_v44, %v2204_v27 }
 0x156   : > { %v5010_v13 = vpop.eup %3764  ;;  %v684_v37 = vxor.u32 2147483648, %v5002_v6  ;;  %v5040_v18 = vsel %vm5006_vm6, 0, %v2206_v34  ;;  %v887_v24 = vxor.u32 2147483648, %v4994_v39  ;;  %v890_v54 = vxor.u32 2147483648, %v4990_v63 }
 0x157   : > { %v681_v2 = vxor.u32 2147483648, %v5010_v13  ;;  %vm5031_vm3 = vcmp.le.f32.partialorder %v5408_v3, 0.7853982  ;;  %vm576_vm4 = vcmp.lt.s32.totalorder %v575_v8, 2  ;;  %vm886_vm5 = vcmp.eq.s32.totalorder %v884_v49, 0 }
 0x158   : > { %2970 = vrot.lane.b32.xlu1 %v4674_v19, %s3934_s19  ;;  %vm889_vm14 = vcmp.eq.s32.totalorder %v884_v49, 2  ;;  %v774_v60 = vsub.s32 4, %v4889_v11  ;;  %v2102_v61 = vsub.s32 4, %v4900_v12  ;;  %v579_v0 = vsel %vm577_vm15, %v4978_v20, %v578_v1 }
 0x159   : > { %2968 = vrot.lane.b32.xlu0 %v4685_v28, %s3934_s19  ;;  %v582_v45 = vsel %vm580_vm1, %v581_v23, %v4987_v41  ;;  %v776_v4 = vsel %vm5031_vm3, %v4312_v25, %v773_v35  ;;  %3766 = vcosq.f32 %v2207_v21  ;;  %v2100_v55 = vxor.u32 2147483648, %v2099_v16 }
 0x15a   : > { %v682_v30 = vsel %vm680_vm10, %v5002_v6, %v681_v2  ;;  %v685_v53 = vsel %vm683_vm12, %v684_v37, %v5010_v13  ;;  %3768 = vsinq.f32 %v2207_v21  ;;  %vm885_vm6 = vcmp.lt.s32.totalorder %v884_v49, 2 }
 0x15b   : > { %v888_v59 = vsel %vm886_vm5, %v4990_v63, %v887_v24  ;;  %v891_v43 = vsel %vm889_vm14, %v890_v54, %v4994_v39  ;;  %v583_v36 = vsel %vm576_vm4, %v579_v0, %v582_v45  ;;  %v775_v52 = vsel %vm690_vm8, %v774_v60, %v4889_v11 }
 0x15c   : > { %1951 = vrot.lane.b32.xlu1 %v4724_v38, %s3934_s19  ;;  %3770 = vcosq.f32 %v776_v4  ;;  %v1091_v51 = vadd.s32 3, %v4976_v15  ;;  %v686_v32 = vsel %vm679_vm9, %v682_v30, %v685_v53  ;;  %v2103_v48 = vsel %vm2018_vm7, %v2102_v61, %v4900_v12 }
 0x15d   : > { %1949 = vrot.lane.b32.xlu0 %v4734_v14, %s3934_s19  ;;  %3772 = vsinq.f32 %v776_v4  ;;  %v987_v62 = vadd.s32 3, %v4982_v26  ;;  %v2101_v56 = vsel %vm2018_vm7, %v2100_v55, %v2099_v16  ;;  %v5084_v40 = vand.u32 3, %v5040_v18  ;;  %s3808_s19 = scalar_lea.vmem %s5260_s5, 512 }
 0x15e   : > { %vm5384_vm8 = vweird.f32 %v4320_v33  ;;  %v892_v11 = vsel %vm885_vm6, %v888_v59, %v891_v43  ;;  %v777_v15 = vsel %vm5031_vm3, 0, %v775_v52  ;;  %v687_v57 = vsel %vm677_vm11, nan, %v686_v32  ;;  %p3809_p8 = scmp.ne.s32.totalorder %s5260_s5, %s3808_s19  ;;  %p3816_p2 = scmp.lt.s32.totalorder %s3814_s9, %s3808_s19 }
 0x15f   : > { %v2105_v12 = vsel %vm5025_vm2, 0, %v2103_v48  ;;  %v584_v26 = vsel %vm574_vm13, nan, %v583_v36  ;;  %v1092_v7 = vand.u32 3, %v1091_v51  ;;  %v2104_v5 = vsel %vm5025_vm2, %v4481_v10, %v2101_v56 }
 0x160   : > { %1963 = vrot.lane.b32.xlu1 %v4724_v38, %s3935_s13  ;;  %v893_v8 = vsel %vm5384_vm8, nan, %v892_v11  ;;  %v988_v46 = vand.u32 3, %v987_v62  ;;  %vm2214_vm7 = vcmp.eq.s32.totalorder %v5084_v40, 0  ;;  %v5101_v58 = vand.u32 3, %v777_v15  ;;  %p3810_p0 = pnand %p3809_p8, %p5420_p11  ;;  %p3817_p5 = por %p3816_p2, %p3815_p13 }
 0x161   : > { %1961 = vrot.lane.b32.xlu0 %v4734_v14, %s3935_s13  ;;  %v5104_v22 = vmul.f32 %v4672_v31, %v687_v57  ;;  %vm2217_vm9 = vcmp.eq.s32.totalorder %v5084_v40, 2  ;;  %v5107_v35 = vand.u32 3, %v2105_v12  ;;  %v5110_v27 = vmul.f32 %v4689_v29, %v584_v26 }
 0x162   : > { %3774 = vcosq.f32 %v2104_v5  ;;  %v5115_v49 = vmul.f32 %v4724_v38, %v893_v8  ;;  %vm1094_vm10 = vcmp.eq.s32.totalorder %v1092_v7, 0  ;;  %vm1097_vm12 = vcmp.eq.s32.totalorder %v1092_v7, 2  ;;  %p3811_p6 = pneg %p3810_p0 }
 0x163   : > { %v5112_v34 = vpop.eup %3766  ;;  %3776 = vsinq.f32 %v2104_v5  ;;  %vm1969_vm15 = vcmask 64512   ;;  %vm990_vm1 = vcmp.eq.s32.totalorder %v988_v46, 0  ;;  %vm993_vm2 = vcmp.eq.s32.totalorder %v988_v46, 2 }
 0x164   : > { %2976 = vrot.lane.b32.xlu1 %v4674_v19, %s3935_s13  ;;  %v5117_v16 = vpop.eup %3768  ;;  %vm2213_vm3 = vcmp.lt.s32.totalorder %v5084_v40, 2  ;;  %vm783_vm5 = vcmp.eq.s32.totalorder %v5101_v58, 0  ;;  %v1299_v38 = vadd.s32 3, %v5000_v47  ;;  %v1195_v9 = vadd.s32 3, %v777_v15  ;;  %p3818_p4 = pnand %p3817_p5, %p3811_p6 }
 0x165   : > { %2974 = vrot.lane.b32.xlu0 %v4685_v28, %s3935_s13  ;;  %v2218_v50 = vxor.u32 2147483648, %v5112_v34  ;;  %vm1093_vm14 = vcmp.lt.s32.totalorder %v1092_v7, 2  ;;  %v1096_v60 = vsel %vm1094_vm10, %v5002_v6, %v681_v2  ;;  %v1099_v61 = vsel %vm1097_vm12, %v684_v37, %v5010_v13 }
 0x166   : > { %v5119_v31 = vpop.eup %3770  ;;  %v2215_v0 = vxor.u32 2147483648, %v5117_v16  ;;  %vm989_vm6 = vcmp.lt.s32.totalorder %v988_v46, 2  ;;  %v992_v47 = vsel %vm990_vm1, %v4978_v20, %v578_v1  ;;  %v995_v45 = vsel %vm993_vm2, %v581_v23, %v4987_v41 }
 0x167   : > { %v5125_v3 = vpop.eup %3772  ;;  %vm2211_vm10 = vweird.f32 %v4389_v44  ;;  %vm786_vm8 = vcmp.eq.s32.totalorder %v5101_v58, 2  ;;  %v787_v6 = vxor.u32 2147483648, %v5119_v31  ;;  %vm1974_vm12 = vcmask 130048  }
 0x168   : > { %vm780_vm4 = vweird.f32 %v4312_v25  ;;  %v784_v13 = vxor.u32 2147483648, %v5125_v3  ;;  %v1100_v1 = vsel %vm1093_vm14, %v1096_v60, %v1099_v61  ;;  %v2419_v37 = vadd.s32 3, %v5040_v18 }
 0x169   : > { %v2315_v20 = vadd.s32 3, %v2105_v12  ;;  %vm2111_vm1 = vcmp.eq.s32.totalorder %v5107_v35, 0  ;;  %v996_v4 = vsel %vm989_vm6, %v992_v47, %v995_v45  ;;  %v1300_v55 = vand.u32 3, %v1299_v38 }
 0x16a   : > { %v1196_v30 = vand.u32 3, %v1195_v9  ;;  %v2216_v53 = vsel %vm2214_vm7, %v5112_v34, %v2215_v0  ;;  %v2219_v18 = vsel %vm2217_vm9, %v2218_v50, %v5117_v16  ;;  %v788_v36 = vsel %vm786_vm8, %v787_v6, %v5125_v3 }
 0x16b   : > { %v1101_v52 = vsel %vm677_vm11, nan, %v1100_v1  ;;  %v785_v62 = vsel %vm783_vm5, %v5119_v31, %v784_v13  ;;  %v997_v11 = vsel %vm574_vm13, nan, %v996_v4  ;;  %vm1302_vm11 = vcmp.eq.s32.totalorder %v1300_v55, 0 }
 0x16c   : > { %v3775_v48 = vpop.eup %3774  ;;  %vm1305_vm8 = vcmp.eq.s32.totalorder %v1300_v55, 2  ;;  %v2420_v7 = vand.u32 3, %v2419_v37  ;;  %vm1198_vm7 = vcmp.eq.s32.totalorder %v1196_v30, 0  ;;  %vm1201_vm9 = vcmp.eq.s32.totalorder %v1196_v30, 2 }
 0x16d   : > { %v3777_v12 = vpop.eup %3776  ;;  %v2316_v8 = vand.u32 3, %v2315_v20  ;;  %v2220_v17 = vsel %vm2213_vm3, %v2216_v53, %v2219_v18  ;;  %vm5411_vm2 = vcmp.lt.s32.totalorder %v5101_v58, 2  ;;  %vm1301_vm5 = vcmp.lt.s32.totalorder %v1300_v55, 2 }
 0x16e   : > { %v789_v46 = vsel %vm5411_vm2, %v785_v62, %v788_v36  ;;  %v2112_v38 = vxor.u32 2147483648, %v3777_v12  ;;  %v2115_v9 = vxor.u32 2147483648, %v3775_v48  ;;  %vm5412_vm14 = vcmask 261120  }
 0x16f   : > { %v1304_v40 = vsel %vm1302_vm11, %v4990_v63, %v887_v24  ;;  %v1307_v58 = vsel %vm1305_vm8, %v890_v54, %v4994_v39  ;;  %vm2114_vm3 = vcmp.eq.s32.totalorder %v5107_v35, 2  ;;  %vm5413_vm6 = vmmov %vm5412_vm14  ;;  %vm1197_vm2 = vcmp.lt.s32.totalorder %v1196_v30, 2 }
 0x170   : > { %v1203_v60 = vsel %vm1201_vm9, %v787_v6, %v5125_v3  ;;  %v2221_v24 = vsel %vm2211_vm10, nan, %v2220_v17  ;;  %vm2110_vm11 = vcmp.lt.s32.totalorder %v5107_v35, 2  ;;  %vm2425_vm13 = vcmp.eq.s32.totalorder %v2420_v7, 2 }
 0x171   : > { %v790_v63 = vsel %vm780_vm4, nan, %v789_v46  ;;  %v1308_v39 = vsel %vm1301_vm5, %v1304_v40, %v1307_v58  ;;  %vm2318_vm8 = vcmp.eq.s32.totalorder %v2316_v8, 0  ;;  %v2113_v54 = vsel %vm2111_vm1, %v3775_v48, %v2112_v38 }
 0x172   : > { %vm2317_vm9 = vcmp.lt.s32.totalorder %v2316_v8, 2  ;;  %v2320_v37 = vsel %vm2318_vm8, %v3775_v48, %v2112_v38  ;;  %vm5414_vm1 = vweird.f32 %v4320_v33  ;;  %v1986_v35 = vmul.f32 %v4734_v14, %v790_v63 }
 0x173   : > { %v2987_v48 = vmul.f32 %v4674_v19, %v2221_v24 }
 0x1c2   : > { %v1948_v29 = vpop.permute.xlu1 %1947 }
 0x1c3   : > { %v1946_v21 = vpop.permute.xlu0 %1945 }
 0x1c6   : > { %v1960_v2 = vpop.permute.xlu1 %1959 }
 0x1c7   : > { %v1971_v41 = vsel %vm1969_vm15, %v1948_v29, %v1960_v2  ;;  %v1958_v23 = vpop.permute.xlu0 %1957 }
 0x1c8   : > { %v1976_v59 = vsel %vm1974_vm12, %v1971_v41, %v1948_v29  ;;  %v1970_v43 = vsel %vm1969_vm15, %v1946_v21, %v1958_v23 }
 0x1c9   : > { %v1981_v51 = vsel %vm1979_vm0, %v1976_v59, %v1960_v2  ;;  %v1975_v32 = vsel %vm1974_vm12, %v1970_v43, %v1946_v21  ;;  %v1200_v21 = vsel %vm1198_vm7, %v5119_v31, %v784_v13  ;;  %v2116_v31 = vsel %vm2114_vm3, %v2115_v9, %v3777_v12 }
 0x1ca   : > { %v1989_v56 = vmul.f32 %v1981_v51, %v1101_v52  ;;  %v1980_v15 = vsel %vm1979_vm0, %v1975_v32, %v1958_v23  ;;  %v5180_v57 = vpop.permute.xlu1 %2970  ;;  %v1204_v3 = vsel %vm1197_vm2, %v1200_v21, %v1203_v60  ;;  %vm2421_vm7 = vcmp.lt.s32.totalorder %v2420_v7, 2 }
 0x1cb   : > { %v1988_v42 = vmul.f32 %v1980_v15, %v997_v11  ;;  %v5182_v26 = vpop.permute.xlu0 %2968  ;;  %v2427_v13 = vsel %vm2425_vm13, %v2218_v50, %v5117_v16  ;;  %v2117_v41 = vsel %vm2110_vm11, %v2113_v54, %v2116_v31  ;;  %v1309_v23 = vsel %vm5414_vm1, nan, %v1308_v39 }
 0x1cc   : > { %v1993_v5 = vadd.f32 %v1989_v56, %v5104_v22  ;;  %v1205_v16 = vsel %vm780_vm4, nan, %v1204_v3  ;;  %vm5415_vm13 = vweird.f32 %v4481_v10 }
 0x1cd   : > { %v1992_v29 = vadd.f32 %v1988_v42, %v5110_v27  ;;  %v2118_v25 = vsel %vm5415_vm13, nan, %v2117_v41  ;;  %vm5417_vm4 = vmmov %vm5415_vm13 }
 0x1ce   : > { %1997 = vst.msk [vmem:[%s5191_s11 + $0x8] sm:$0xff] %vm5412_vm14, %v1993_v5  ;;  %v1952_v22 = vpop.permute.xlu1 %1951  ;;  %vm2422_vm14 = vcmp.eq.s32.totalorder %v2420_v7, 0  ;;  %v2986_v11 = vmul.f32 %v4685_v28, %v2118_v25 }
 0x1cf   : > { %1996 = vst.msk [vmem:[%s5191_s11] sm:$0xff] %vm5413_vm6, %v1992_v29  ;;  %v1950_v27 = vpop.permute.xlu0 %1949  ;;  %vm2321_vm6 = vcmp.eq.s32.totalorder %v2316_v8, 2  ;;  %v2424_v6 = vsel %vm2422_vm14, %v5112_v34, %v2215_v0 }
 0x1d0   : > { %v2323_v20 = vsel %vm2321_vm6, %v2115_v9, %v3777_v12  ;;  %v2428_v30 = vsel %vm2421_vm7, %v2424_v6, %v2427_v13 }
 0x1d1   : > { %v2324_v59 = vsel %vm2317_vm9, %v2320_v37, %v2323_v20  ;;  %v2429_v51 = vsel %vm2211_vm10, nan, %v2428_v30 }
 0x1d2   : > { %v1964_v61 = vpop.permute.xlu1 %1963  ;;  %v2325_v44 = vsel %vm5417_vm4, nan, %v2324_v59 }
 0x1d3   : > { %v1973_v47 = vsel %vm1969_vm15, %v1952_v22, %v1964_v61  ;;  %v1962_v45 = vpop.permute.xlu0 %1961 }
 0x1d4   : > { %v1978_v2 = vsel %vm1974_vm12, %v1973_v47, %v1952_v22  ;;  %v1972_v1 = vsel %vm1969_vm15, %v1950_v27, %v1962_v45 }
 0x1d5   : > { %v1983_v0 = vsel %vm1979_vm0, %v1978_v2, %v1964_v61  ;;  %v1977_v4 = vsel %vm1974_vm12, %v1972_v1, %v1950_v27 }
 0x1d6   : > { %v1991_v34 = vmul.f32 %v1983_v0, %v1309_v23  ;;  %v1982_v50 = vsel %vm1979_vm0, %v1977_v4, %v1962_v45  ;;  %v2977_v55 = vpop.permute.xlu1 %2976 }
 0x1d7   : > { %v1990_v33 = vmul.f32 %v1982_v50, %v1205_v16  ;;  %v2981_v53 = vsel %vm1969_vm15, %v5180_v57, %v2977_v55  ;;  %v2975_v18 = vpop.permute.xlu0 %2974 }
 0x1d8   : > { %v1995_v43 = vadd.f32 %v1991_v34, %v5115_v49  ;;  %v2983_v36 = vsel %vm1974_vm12, %v2981_v53, %v5180_v57  ;;  %v2980_v14 = vsel %vm1969_vm15, %v5182_v26, %v2975_v18  ;;  %vm5416_vm15 = vcmask 261120  }
 0x1d9   : > { %v1994_v52 = vadd.f32 %v1990_v33, %v1986_v35  ;;  %v2985_v32 = vsel %vm1979_vm0, %v2983_v36, %v2977_v55  ;;  %v2982_v49 = vsel %vm1974_vm12, %v2980_v14, %v5182_v26  ;;  %vm5419_vm10 = vmmov %vm5416_vm15 }
 0x1da   : > { %1999 = vst.msk [vmem:[%s5191_s11 + $0x18] sm:$0xff] %vm5416_vm15, %v1995_v43  ;;  %v2989_v62 = vmul.f32 %v2985_v32, %v2429_v51  ;;  %v2984_v56 = vsel %vm1979_vm0, %v2982_v49, %v2975_v18 }
 0x1db   : > { %1998 = vst.msk [vmem:[%s5191_s11 + $0x10] sm:$0xff] %vm5419_vm10, %v1994_v52  ;;  %v2988_v19 = vmul.f32 %v2984_v56, %v2325_v44 }
 0x1dc   : > { %v2991_v15 = vadd.f32 %v2989_v62, %v2987_v48 }
 0x1dd   : > { %3821 = shalt.err (!%p3818_p4)
}
 0x1de   : > { %s3822_s11 = scalar_lea.hbm %s5253_s23, 512  ;;  %s3826_s12 = scalar_lea.hbm %s5375_s6, 1024 }
 0x1df   : > { %p3823_p7 = scmp.ne.s32.totalorder %s5253_s23, %s3822_s11  ;;  %p3827_p1 = scmp.lt.u32.totalorder %s5253_s23, %s5375_s6 }
 0x1e0   : > { %p3828_p3 = scmp.lt.u32.totalorder %s3826_s12, %s3822_s11  ;;  %p3830_p8 = scmp.lt.u32.totalorder %s3822_s11, %s5253_s23 }
 0x1e1   : > { %p3824_p10 = pnand %p3823_p7, %p5420_p11 }
 0x1e2   : > { %p3829_p9 = por %p3828_p3, %p3827_p1 }
 0x1e3   : > { %p3825_p12 = pneg %p3824_p10 }
 0x1e4   : > { %p3831_p0 = por %p3830_p8, %p3829_p9 }
 0x1e6   : > { %p3832_p6 = pnand %p3831_p0, %p3825_p12 }
 0x1e8   : > { %3835 = shalt.err (!%p3832_p6)
}
 0x1e9   : > { %s3937_s19 = smov 128   ;;  %v2990_v10 = vadd.f32 %v2988_v19, %v2986_v11  ;;  %s5309_s11 = scalar_lea.hbm %s5376_s7, %s3288_s22  ;;  %vm5422_vm0 = vmmov %vm5419_vm10 }
 0x1ea   : > { %3675 = dma.vmem_to_hbm [thread:$0]  (%p5420_p11), %s5260_s5, 512, %s5253_s23, %s2995_s18, %s3937_s19, %s3937_s19, %s3935_s13   ;;  %vm5423_vm12 = vmmov %vm5422_vm0 }
 0x1eb   : > { %s5421_s21 = sshll.u32 %s5271_s8, 4  ;;  %2993 = vst.msk [vmem:[%s5271_s8 + $0x8] sm:$0xff] %vm5422_vm0, %v2991_v15  ;;  %s3000_s30 = scalar_lea.sflag [#allocation7], %s4091_s20  ;;  %s5313_s21 = int_to_ptr.vmem [resolvable:$true] %s5421_s21 }
 0x1ec   : > { %2992 = vst.msk [vmem:[%s5271_s8] sm:$0xff] %vm5423_vm12, %v2990_v10  ;;  %s3836_s12 = scalar_lea.vmem %s5313_s21, 256  ;;  %s3938_s27 = smov [#allocation6]  }
 0x1ed   : > { %p3837_p13 = scmp.ne.s32.totalorder %s5313_s21, %s3836_s12  ;;  %s3840_s5 = sshll.u32 %s3938_s27, 4  ;;  %s3841_s5 = int_to_ptr.vmem [resolvable:$false] %s3840_s5 }
 0x1ee   : > { %s3842_s23 = scalar_lea.vmem %s3841_s5, 512  ;;  %p3843_p4 = scmp.lt.s32.totalorder %s5313_s21, %s3841_s5 }
 0x1ef   : > { %p3838_p2 = pnand %p3837_p13, %p5420_p11  ;;  %p3844_p7 = scmp.lt.s32.totalorder %s3842_s23, %s3836_s12 }
 0x1f1   : > { %p3839_p5 = pneg %p3838_p2  ;;  %p3845_p10 = por %p3844_p7, %p3843_p4 }
 0x1f3   : > { %p3846_p12 = pnand %p3845_p10, %p3839_p5 }
 0x1f5   : > { %3849 = shalt.err (!%p3846_p12)
}
 0x1f6   : > { %s3850_s22 = scalar_lea.hbm %s5309_s11, 256  ;;  %s3854_s17 = scalar_lea.hbm %s5376_s7, 512 }
 0x1f7   : > { %p3851_p1 = scmp.ne.s32.totalorder %s5309_s11, %s3850_s22  ;;  %p3855_p8 = scmp.lt.u32.totalorder %s5309_s11, %s5376_s7 }
 0x1f8   : > { %p3856_p0 = scmp.lt.u32.totalorder %s3854_s17, %s3850_s22  ;;  %p3858_p13 = scmp.lt.u32.totalorder %s3850_s22, %s5309_s11 }
 0x1f9   : > { %p3852_p3 = pnand %p3851_p1, %p5420_p11 }
 0x1fa   : > { %p3857_p6 = por %p3856_p0, %p3855_p8 }
 0x1fb   : > { %p3853_p9 = pneg %p3852_p3 }
 0x1fc   : > { %p3859_p2 = por %p3858_p13, %p3857_p6 }
 0x1fe   : > { %p3860_p5 = pnand %p3859_p2, %p3853_p9 }
 0x200   : > { %3863 = shalt.err (!%p3860_p5)
}
 0x201   : > { %3676 = dma.vmem_to_hbm [thread:$0]  (%p5420_p11), %s5313_s21, 256, %s5309_s11, %s3000_s30, %s3937_s19, %s3937_s19, %s3935_s13  }
 0x202 PF: > { %s3048_s12 = sand.u32 1, %s3902_s24   ;;  %p5424_p4 = scmp.ne.s32.totalorder %s5391_s16, 0 }
 0x203   : > { %p5425_p7 = scmp.ge.s32.totalorder %s3922_s29, 2  ;;  %s3049_s27 = scalar_lea.sflag [#allocation4], %s3048_s12 }
 0x205   : > { %p3684_p10 = pnand %p5425_p7, %p5424_p4 }
 0x207   : > { %3893 = dma.done.wait (!%p3684_p10), %s3049_s27, 512  }
 0x208   : > { %3895 = vsyncadd (!%p3684_p10), %s3049_s27, 4294966784  ;;  %s3058_s14 = scalar_lea.sflag [#allocation7], %s3048_s12 }
 0x209   : > { %3897 = dma.done.wait (!%p3684_p10), %s3058_s14, 256  }
 0x20a   : > { %3899 = vsyncadd (!%p3684_p10), %s3058_s14, 4294967040  ;;  %s27_s29 = sadd.s32 1, %s3922_s29   ;;  %s5426_s20 = sld [smem:[#allocation11_spill]] }
 0x20b   : > { %p24_p12 = scmp.ge.s32.totalorder %s27_s29, 4   ;;  %s5427_s24 = smov %s3906_s25 }
 0x20c   : > { %s5428_s25 = smov %s3910_s26  ;;  %s5429_s26 = smov %s4035_s15 }
 0x20d   : > { %s5430_s27 = smov %s3918_s28  ;;  %26 = sbr.rel (!%p24_p12) target bundleno = 10 (0xa), region = 115 }
 0x210   : > { %s5431_s28 = smov %s5426_s20 }
 0x214   :  { %3063 = vsyncpa [#allocation3], 1 }
 0x215   :  { %3065 = vsyncpa [#allocation3 + $0x1], 1 }
 0x216   :  { %3066 = vsyncpa [#allocation4], 1 }
 0x217   :  { %3068 = vsyncpa [#allocation4 + $0x1], 1 }
 0x218   :  { %3069 = vsyncpa [#allocation7], 1 }
 0x219   :  { %3071 = vsyncpa [#allocation7 + $0x1], 1 }

</bundles_post_ra>
